<compile_context>
chip_gen: v6e
topology: v6e:2x2x1
jax: 0.10.0
libtpu: 0.0.40
codegen_flags: <defaults>
</compile_context>

<pallas_src>
import functools

import numpy as np
import jax
import jax.numpy as jnp
from jax import lax
from jax.experimental import pallas as pl
from jax.experimental.pallas import tpu as pltpu

_BN_EPS = 1e-5
_L2_EPS_SQ = 1e-24  # F.normalize clamps ||y||_2 at 1e-12


def _round_up(x, m):
    return ((int(x) + m - 1) // m) * m


def _largest_divisor_leq(dim, target):
    t = max(1, min(int(target), int(dim)))
    while dim % t != 0:
        t -= 1
    return t


def _vmem_budget_bytes():
    """Per-generation VMEM budget (80% of capacity; fallback 64 MiB)."""
    cap = 64 * 1024 * 1024
    try:
        info = pltpu.get_tpu_info()
        cap = int(getattr(info, "vmem_capacity_bytes", cap)) or cap
    except Exception:
        pass
    return max(32 * 1024 * 1024, int(cap * 0.8))


def prepare_linear_weight(weight, compute_dtype=jnp.bfloat16):
    """One-time init-time prep: PyTorch [out,in] -> [in,out] in MXU dtype."""
    return jnp.asarray(weight).T.astype(compute_dtype)


# ----------------------------------------------------------------------------
# Fully fused fast path: matmul + BN (in-kernel batch stats) + ReLU + L2 norm.
# Used when the whole (padded) batch x out_dim fits VMEM: removes the y
# round-trip (2*N*out_dim*4B of HBM) and the second launch entirely.
# ----------------------------------------------------------------------------
def _fused_mlp_kernel(x_ref, w_ref, p_ref, o_ref, acc_ref, *,
                      n_true, use_bn, use_act, has_l2norm):
    k = pl.program_id(0)

    @pl.when(k == 0)
    def _():
        acc_ref[...] = jnp.zeros_like(acc_ref)

    # Native bf16 operands straight to the MXU; accumulate in f32.
    acc_ref[...] += jnp.dot(x_ref[...], w_ref[...],
                            preferred_element_type=jnp.float32)

    @pl.when(k == pl.num_programs(0) - 1)
    def _():
        y = acc_ref[...]
        if use_bn:
            # Training-mode batch statistics over the true batch rows.  The
            # Linear bias is never added pre-BN (it cancels exactly in the
            # mean subtraction), so zero-padded rows contribute exactly 0.
            inv_n = jnp.float32(1.0 / n_true)
            mean = jnp.sum(y, axis=0, keepdims=True) * inv_n
            var = jnp.maximum(
                jnp.sum(y * y, axis=0, keepdims=True) * inv_n - mean * mean,
                0.0)
            scale = p_ref[0:1, :] * lax.rsqrt(var + _BN_EPS)   # gamma row
            shift = p_ref[1:2, :] - mean * scale               # beta row
            y = y * scale + shift
        else:
            y = y + p_ref[1:2, :]   # Linear bias (row 1)
        # TODO(synk): Dropout treated as identity (dropout=0.0 in the example).
        if use_act:
            y = jnp.maximum(y, 0.0)
        if has_l2norm:
            sq = jnp.sum(y * y, axis=1, keepdims=True)
            y = y * lax.rsqrt(jnp.maximum(sq, _L2_EPS_SQ))
        o_ref[...] = y.astype(o_ref.dtype)


# ----------------------------------------------------------------------------
# Pass 1 (general path): tiled matmul + per-(M,N)-tile BN partial statistics.
# No bias add here (cancels under BN / folded into pass-2 shift otherwise).
# ----------------------------------------------------------------------------
def _matmul_stats_kernel(x_ref, w_ref, y_ref, stats_ref, acc_ref, *, use_bn):
    k = pl.program_id(2)

    @pl.when(k == 0)
    def _():
        acc_ref[...] = jnp.zeros_like(acc_ref)

    acc_ref[...] += jnp.dot(x_ref[...], w_ref[...],
                            preferred_element_type=jnp.float32)

    @pl.when(k == pl.num_programs(2) - 1)
    def _():
        y = acc_ref[...]
        y_ref[...] = y.astype(y_ref.dtype)   # bf16 intermediate; stats stay f32
        if use_bn:
            stats_ref[0:1, :] = jnp.sum(y, axis=0, keepdims=True)
            stats_ref[1:2, :] = jnp.sum(y * y, axis=0, keepdims=True)
        else:
            stats_ref[...] = jnp.zeros_like(stats_ref)


# ----------------------------------------------------------------------------
# Pass 2 (general path): folded scale/shift + ReLU + per-row L2 normalize.
# ----------------------------------------------------------------------------
def _bn_act_l2_kernel(y_ref, p_ref, o_ref, *, use_act, has_l2norm):
    y = y_ref[...].astype(jnp.float32)
    y = y * p_ref[0:1, :] + p_ref[1:2, :]   # scale / shift rows
    # TODO(synk): Dropout treated as identity.
    if use_act:
        y = jnp.maximum(y, 0.0)
    if has_l2norm:
        sq = jnp.sum(y * y, axis=1, keepdims=True)
        y = y * lax.rsqrt(jnp.maximum(sq, _L2_EPS_SQ))
    o_ref[...] = y.astype(o_ref.dtype)


def mlp_layer_forward(x, w_t, bias, bn_gamma=None, bn_beta=None, *,
                      use_bn=True, use_act=True, has_l2norm=True,
                      compute_dtype=jnp.bfloat16, max_fused_rows=1024):
    """x: [N, in_dim]; w_t: [in_dim, out_dim] (pre-transposed at init);
    bias / bn_gamma / bn_beta: [out_dim]."""
    n, in_dim = x.shape
    out_dim = w_t.shape[1]
    out_dtype = x.dtype
    budget = _vmem_budget_bytes()
    bc = np.dtype(compute_dtype).itemsize
    bo = np.dtype(out_dtype).itemsize

    # ------------------------ fused single-kernel fast path -----------------
    n8 = _round_up(n, 8)
    out_pf = _round_up(out_dim, 128)
    tk_f = min(1024, _round_up(in_dim, 128))
    in_pf = _round_up(in_dim, tk_f)
    fused_vmem = (n8 * out_pf * 4            # f32 accumulator
                  + 2 * n8 * tk_f * bc       # x double buffer
                  + 2 * tk_f * out_pf * bc   # w double buffer
                  + 2 * n8 * out_pf * bo     # output
                  + 8 * out_pf * 4)          # packed params
    use_fused = (n8 <= max_fused_rows) and (fused_vmem <= budget)

    if use_fused:
        if use_bn:
            row0 = bn_gamma.astype(jnp.float32)
            row1 = bn_beta.astype(jnp.float32)
        else:
            row0 = jnp.ones((out_dim,), jnp.float32)
            row1 = bias.astype(jnp.float32)
        params = jnp.zeros((8, out_pf), jnp.float32)
        params = params.at[0, :out_dim].set(row0).at[1, :out_dim].set(row1)

        x_p = jnp.pad(x.astype(compute_dtype),
                      ((0, n8 - n), (0, in_pf - in_dim)))
        w_p = jnp.pad(w_t.astype(compute_dtype),
                      ((0, in_pf - in_dim), (0, out_pf - out_dim)))

        kern = functools.partial(_fused_mlp_kernel, n_true=n, use_bn=use_bn,
                                 use_act=use_act, has_l2norm=has_l2norm)
        out = pl.pallas_call(
            kern,
            out_shape=jax.ShapeDtypeStruct((n8, out_pf), out_dtype),
            grid=(in_pf // tk_f,),
            in_specs=[
                pl.BlockSpec((n8, tk_f), lambda k: (0, k)),
                pl.BlockSpec((tk_f, out_pf), lambda k: (k, 0)),
                pl.BlockSpec((8, out_pf), lambda k: (0, 0)),
            ],
            out_specs=pl.BlockSpec((n8, out_pf), lambda k: (0, 0)),
            scratch_shapes=[pltpu.VMEM((n8, out_pf), jnp.float32)],
            compiler_params=pltpu.CompilerParams(
                dimension_semantics=("arbitrary",),
                vmem_limit_bytes=budget),
        )(x_p, w_p, params)
        return out[:n, :out_dim]

    # ------------------------------ two-pass path ---------------------------
    y_dtype = jnp.bfloat16 if bc == 2 else jnp.float32
    by = np.dtype(y_dtype).itemsize

    tn = min(1024, _round_up(out_dim, 128))
    tk = min(1024, _round_up(in_dim, 128))
    out_p = _round_up(out_dim, tn)
    in_p = _round_up(in_dim, tk)

    # Solve tm from the per-step VMEM footprint; clamp and keep v7x's 2 TCs busy.
    fixed = 2 * tk * tn * bc + 2 * 2 * tn * 4 + 8 * tn * 4
    per_row = 2 * tk * bc + 2 * tn * by + tn * 4
    tm = max(8, min((budget - fixed) // per_row, 1024, _round_up(n, 8)))
    tm = min(tm, max(8, _round_up(-(-n // 2), 8)))   # mt >= 2 when n >= 16
    tm = (tm // 8) * 8
    n_p = _round_up(n, tm)
    mt, nt, kt = n_p // tm, out_p // tn, in_p // tk

    x_p = jnp.pad(x.astype(compute_dtype), ((0, n_p - n), (0, in_p - in_dim)))
    w_p = jnp.pad(w_t.astype(compute_dtype),
                  ((0, in_p - in_dim), (0, out_p - out_dim)))

    kern1 = functools.partial(_matmul_stats_kernel, use_bn=use_bn)
    y, stats = pl.pallas_call(
        kern1,
        out_shape=(jax.ShapeDtypeStruct((n_p, out_p), y_dtype),
                   jax.ShapeDtypeStruct((mt, 2, out_p), jnp.float32)),
        grid=(mt, nt, kt),
        in_specs=[
            pl.BlockSpec((tm, tk), lambda i, j, k: (i, k)),
            pl.BlockSpec((tk, tn), lambda i, j, k: (k, j)),
        ],
        out_specs=(
            pl.BlockSpec((tm, tn), lambda i, j, k: (i, j)),
            pl.BlockSpec((None, 2, tn), lambda i, j, k: (i, 0, j)),
        ),
        scratch_shapes=[pltpu.VMEM((tm, tn), jnp.float32)],
        compiler_params=pltpu.CompilerParams(
            dimension_semantics=("parallel", "parallel", "arbitrary"),
            vmem_limit_bytes=budget),
    )(x_p, w_p)

    # Fold BatchNorm (training-mode batch stats) into a single scale/shift.
    if use_bn:
        total = jnp.sum(stats[:, 0, :], axis=0)
        total_sq = jnp.sum(stats[:, 1, :], axis=0)
        mean = total / n                      # padded rows contribute exactly 0
        var = jnp.maximum(total_sq / n - mean * mean, 0.0)
        gamma_p = jnp.pad(bn_gamma.astype(jnp.float32), (0, out_p - out_dim))
        beta_p = jnp.pad(bn_beta.astype(jnp.float32), (0, out_p - out_dim))
        scale = gamma_p * lax.rsqrt(var + _BN_EPS)
        shift = beta_p - mean * scale         # Linear bias cancels exactly
    else:
        scale = jnp.ones((out_p,), jnp.float32)
        shift = jnp.pad(bias.astype(jnp.float32), (0, out_p - out_dim))
    params = jnp.zeros((8, out_p), jnp.float32).at[0].set(scale).at[1].set(shift)

    # Pass 2 row tile is decoupled from tm: as wide as VMEM allows (HBM-bound).
    per_row2 = out_p * (2 * by + 2 * bo + 8) + 8 * out_p * 4 // max(1, tm)
    tm2_target = max(tm, min(2048, budget // max(per_row2, 1)))
    tm2 = tm * _largest_divisor_leq(mt, max(1, tm2_target // tm))

    kern2 = functools.partial(_bn_act_l2_kernel, use_act=use_act,
                              has_l2norm=has_l2norm)
    out = pl.pallas_call(
        kern2,
        out_shape=jax.ShapeDtypeStruct((n_p, out_p), out_dtype),
        grid=(n_p // tm2,),
        in_specs=[
            pl.BlockSpec((tm2, out_p), lambda i: (i, 0)),
            pl.BlockSpec((8, out_p), lambda i: (0, 0)),
        ],
        out_specs=pl.BlockSpec((tm2, out_p), lambda i: (i, 0)),
        compiler_params=pltpu.CompilerParams(
            dimension_semantics=("parallel",),
            vmem_limit_bytes=budget),
    )(y, params)
    return out[:n, :out_dim]


def _reference(x, weight, bias, gamma, beta, use_bn, use_act, has_l2norm):
    y = x @ weight.T + bias
    if use_bn:
        mean = jnp.mean(y, axis=0, keepdims=True)
        var = jnp.mean((y - mean) ** 2, axis=0, keepdims=True)
        y = gamma * (y - mean) / jnp.sqrt(var + _BN_EPS) + beta
    if use_act:
        y = jnp.maximum(y, 0.0)
    if has_l2norm:
        norm = jnp.sqrt(jnp.sum(y * y, axis=1, keepdims=True))
        y = y / jnp.maximum(norm, 1e-12)
    return y


if __name__ == "__main__":
    # MLPLayer(in_dim, out_dim, act=ReLU, use_bn=True, has_l2norm=True, dropout=0.0)
    N, IN_DIM, OUT_DIM = 256, 512, 128

    key = jax.random.PRNGKey(0)
    kx, kw, kb, kg = jax.random.split(key, 4)

    x = jax.random.normal(kx, (N, IN_DIM), dtype=jnp.float32)
    # weights_init(): Linear.weight ~ N(0, 0.02); Linear.bias = default uniform;
    #                 BatchNorm.weight ~ N(1, 0.02); BatchNorm.bias = 0
    weight = 0.02 * jax.random.normal(kw, (OUT_DIM, IN_DIM), dtype=jnp.float32)
    bound = 1.0 / float(IN_DIM) ** 0.5
    bias = jax.random.uniform(kb, (OUT_DIM,), minval=-bound, maxval=bound,
                              dtype=jnp.float32)
    bn_gamma = 1.0 + 0.02 * jax.random.normal(kg, (OUT_DIM,), dtype=jnp.float32)
    bn_beta = jnp.zeros((OUT_DIM,), dtype=jnp.float32)

    # One-time init-time layout/dtype prep (NOT in the per-call hot path).
    w_t = prepare_linear_weight(weight, compute_dtype=jnp.bfloat16)

    ref = _reference(x, weight, bias, bn_gamma, bn_beta,
                     use_bn=True, use_act=True, has_l2norm=True)

    # Fused fast path (the shape above fits in one tile -> single kernel).
    fwd = jax.jit(functools.partial(mlp_layer_forward, use_bn=True,
                                    use_act=True, has_l2norm=True))
    out = jax.block_until_ready(fwd(x, w_t, bias, bn_gamma, bn_beta))
    assert out.shape == (N, OUT_DIM)
    err = float(jnp.max(jnp.abs(out.astype(jnp.float32) - ref)))
    assert err < 2e-2, f"fused path mismatch: max abs err {err}"

    # Also exercise the tiled two-pass path (bf16 intermediate y).
    fwd2 = jax.jit(functools.partial(mlp_layer_forward, use_bn=True,
                                     use_act=True, has_l2norm=True,
                                     max_fused_rows=0))
    out2 = jax.block_until_ready(fwd2(x, w_t, bias, bn_gamma, bn_beta))
    err2 = float(jnp.max(jnp.abs(out2.astype(jnp.float32) - ref)))
    assert err2 < 3e-2, f"two-pass path mismatch: max abs err {err2}"

    print("KERNEL_OK")
</pallas_src>

<mosaic_0001>
module attributes {stable_mosaic.version = 11 : i64} {
  func.func @_fused_mlp_kernel(%arg0: i32, %arg1: memref<256x512xbf16, #tpu.memory_space<vmem>>, %arg2: memref<512x128xbf16, #tpu.memory_space<vmem>>, %arg3: memref<8x128xf32, #tpu.memory_space<vmem>>, %arg4: memref<256x128xf32, #tpu.memory_space<vmem>>, %arg5: memref<256x128xf32, #tpu.memory_space<vmem>>) attributes {dimension_semantics = [#tpu.dimension_semantics<arbitrary>], iteration_bounds = array<i64: 1>, scalar_prefetch = 0 : i64, scratch_operands = 1 : i64, tpu.core_type = #tpu.core_type<tc>, window_params = [{transform_indices = @transform_0, window_bounds = array<i64: 256, 512>}, {transform_indices = @transform_1, window_bounds = array<i64: 512, 128>}, {pipeline_mode = #tpu.pipeline_mode<synchronous>, transform_indices = @transform_2, window_bounds = array<i64: 8, 128>}, {pipeline_mode = #tpu.pipeline_mode<synchronous>, transform_indices = @transform_3, window_bounds = array<i64: 256, 128>}]} {
    %c0_i32 = arith.constant 0 : i32
    %0 = arith.cmpi eq, %arg0, %c0_i32 : i32
    %1 = arith.extui %0 : i1 to i32
    %c0_i32_0 = arith.constant 0 : i32
    %2 = arith.cmpi ne, %1, %c0_i32_0 : i32
    scf.if %2 {
      %cst_10 = arith.constant 0.000000e+00 : f32
      %12 = vector.broadcast %cst_10 : f32 to vector<256x128xf32>
      %c0_11 = arith.constant 0 : index
      %c0_12 = arith.constant 0 : index
      %13 = vector.load %arg5[%c0_11, %c0_12] : memref<256x128xf32, #tpu.memory_space<vmem>>, vector<256x128xf32>
      tpu.vector_store %arg5[%c0_11, %c0_12], %12 {strides = array<i32>} : memref<256x128xf32, #tpu.memory_space<vmem>>, vector<256x128xf32>,
    } else {
    }
    %c0 = arith.constant 0 : index
    %c0_1 = arith.constant 0 : index
    %3 = vector.load %arg5[%c0, %c0_1] : memref<256x128xf32, #tpu.memory_space<vmem>>, vector<256x128xf32>
    %c0_2 = arith.constant 0 : index
    %c0_3 = arith.constant 0 : index
    %4 = vector.load %arg1[%c0_2, %c0_3] : memref<256x512xbf16, #tpu.memory_space<vmem>>, vector<256x512xbf16>
    %c0_4 = arith.constant 0 : index
    %c0_5 = arith.constant 0 : index
    %5 = vector.load %arg2[%c0_4, %c0_5] : memref<512x128xbf16, #tpu.memory_space<vmem>>, vector<512x128xbf16>
    %cst = arith.constant dense<0.000000e+00> : vector<256x128xf32>
    %6 = tpu.matmul %4, %5, %cst {dimension_numbers = #tpu.dot_dimension_numbers<[1], [0], [0], [1], [0, 0, 1, 1], [], []>} : vector<256x512xbf16>, vector<512x128xbf16>, vector<256x128xf32> -> vector<256x128xf32>
    %7 = arith.addf %3, %6 : vector<256x128xf32>
    %c0_6 = arith.constant 0 : index
    %c0_7 = arith.constant 0 : index
    %8 = vector.load %arg5[%c0_6, %c0_7] : memref<256x128xf32, #tpu.memory_space<vmem>>, vector<256x128xf32>
    tpu.vector_store %arg5[%c0_6, %c0_7], %7 {strides = array<i32>} : memref<256x128xf32, #tpu.memory_space<vmem>>, vector<256x128xf32>,
    %c0_i32_8 = arith.constant 0 : i32
    %9 = arith.cmpi eq, %arg0, %c0_i32_8 : i32
    %10 = arith.extui %9 : i1 to i32
    %c0_i32_9 = arith.constant 0 : i32
    %11 = arith.cmpi ne, %10, %c0_i32_9 : i32
    scf.if %11 {
      %c0_10 = arith.constant 0 : index
      %c0_11 = arith.constant 0 : index
      %12 = vector.load %arg5[%c0_10, %c0_11] : memref<256x128xf32, #tpu.memory_space<vmem>>, vector<256x128xf32>
      %cst_12 = arith.constant dense<0.000000e+00> : vector<128xf32>
      %13 = vector.multi_reduction <add>, %12, %cst_12 [0] : vector<256x128xf32> to vector<128xf32>
      %14 = vector.shape_cast %13 : vector<128xf32> to vector<1x128xf32>
      %cst_13 = arith.constant 3.906250e-03 : f32
      %15 = vector.broadcast %cst_13 : f32 to vector<1x128xf32>
      %16 = arith.mulf %14, %15 : vector<1x128xf32>
      %17 = arith.mulf %12, %12 : vector<256x128xf32>
      %cst_14 = arith.constant dense<0.000000e+00> : vector<128xf32>
      %18 = vector.multi_reduction <add>, %17, %cst_14 [0] : vector<256x128xf32> to vector<128xf32>
      %19 = vector.shape_cast %18 : vector<128xf32> to vector<1x128xf32>
      %cst_15 = arith.constant 3.906250e-03 : f32
      %20 = vector.broadcast %cst_15 : f32 to vector<1x128xf32>
      %21 = arith.mulf %19, %20 : vector<1x128xf32>
      %22 = arith.mulf %16, %16 : vector<1x128xf32>
      %23 = arith.subf %21, %22 : vector<1x128xf32>
      %cst_16 = arith.constant 0.000000e+00 : f32
      %24 = vector.broadcast %cst_16 : f32 to vector<1x128xf32>
      %25 = arith.maximumf %23, %24 : vector<1x128xf32>
      %c0_17 = arith.constant 0 : index
      %c0_18 = arith.constant 0 : index
      %26 = vector.load %arg3[%c0_17, %c0_18] : memref<8x128xf32, #tpu.memory_space<vmem>>, vector<1x128xf32>
      %cst_19 = arith.constant 9.99999974E-6 : f32
      %27 = vector.broadcast %cst_19 : f32 to vector<1x128xf32>
      %28 = arith.addf %25, %27 : vector<1x128xf32>
      %29 = math.rsqrt %28 : vector<1x128xf32>
      %30 = arith.mulf %26, %29 : vector<1x128xf32>
      %c1 = arith.constant 1 : index
      %c0_20 = arith.constant 0 : index
      %31 = vector.load %arg3[%c1, %c0_20] : memref<8x128xf32, #tpu.memory_space<vmem>>, vector<1x128xf32>
      %32 = arith.mulf %16, %30 : vector<1x128xf32>
      %33 = arith.subf %31, %32 : vector<1x128xf32>
      %34 = vector.broadcast %30 : vector<1x128xf32> to vector<256x128xf32>
      %35 = arith.mulf %12, %34 : vector<256x128xf32>
      %36 = vector.broadcast %33 : vector<1x128xf32> to vector<256x128xf32>
      %37 = arith.addf %35, %36 : vector<256x128xf32>
      %cst_21 = arith.constant 0.000000e+00 : f32
      %38 = vector.broadcast %cst_21 : f32 to vector<256x128xf32>
      %39 = arith.maximumf %37, %38 : vector<256x128xf32>
      %40 = arith.mulf %39, %39 : vector<256x128xf32>
      %cst_22 = arith.constant dense<0.000000e+00> : vector<256xf32>
      %41 = vector.multi_reduction <add>, %40, %cst_22 [1] : vector<256x128xf32> to vector<256xf32>
      %42 = vector.shape_cast %41 : vector<256xf32> to vector<256x1xf32>
      %cst_23 = arith.constant 1.000000e-24 : f32
      %43 = vector.broadcast %cst_23 : f32 to vector<256x1xf32>
      %44 = arith.maximumf %42, %43 : vector<256x1xf32>
      %45 = math.rsqrt %44 : vector<256x1xf32>
      %46 = vector.broadcast %45 : vector<256x1xf32> to vector<256x128xf32>
      %47 = arith.mulf %39, %46 : vector<256x128xf32>
      %c0_24 = arith.constant 0 : index
      %c0_25 = arith.constant 0 : index
      %48 = vector.load %arg4[%c0_24, %c0_25] : memref<256x128xf32, #tpu.memory_space<vmem>>, vector<256x128xf32>
      tpu.vector_store %arg4[%c0_24, %c0_25], %47 {strides = array<i32>} : memref<256x128xf32, #tpu.memory_space<vmem>>, vector<256x128xf32>,
    } else {
    }
    return
  }
  func.func @transform_0(%arg0: i32) -> (i32, i32) {
    %c0_i32 = arith.constant 0 : i32
    %c0_i32_0 = arith.constant 0 : i32
    return %c0_i32, %arg0 : i32, i32
  }
  func.func @transform_1(%arg0: i32) -> (i32, i32) {
    %c0_i32 = arith.constant 0 : i32
    %c0_i32_0 = arith.constant 0 : i32
    return %arg0, %c0_i32 : i32, i32
  }
  func.func @transform_2(%arg0: i32) -> (i32, i32) {
    %c0_i32 = arith.constant 0 : i32
    %c0_i32_0 = arith.constant 0 : i32
    %c0_i32_1 = arith.constant 0 : i32
    return %c0_i32, %c0_i32_0 : i32, i32
  }
  func.func @transform_3(%arg0: i32) -> (i32, i32) {
    %c0_i32 = arith.constant 0 : i32
    %c0_i32_0 = arith.constant 0 : i32
    %c0_i32_1 = arith.constant 0 : i32
    return %c0_i32, %c0_i32_0 : i32, i32
  }
}

</mosaic_0001>

<bundles_post_ra>
// kernel: mlp_layer_forward.1
= control target key start
LH: loop header
LB: loop body
LE: loop exit
PB: predicated region body
PF: predicated region fallthrough
CT: control target
= control target key end

     0   :  { %s3054_s0 = inlined_call_operand.vmem [shape: bf16[256,512], index: 0, kind: input, shape index: {}]   ;;  %s3055_s1 = inlined_call_operand.vmem [shape: bf16[512,128], index: 1, kind: input, shape index: {}]   ;;  %s3056_s2 = inlined_call_operand.vmem [shape: f32[8,128], index: 2, kind: input, shape index: {}]   ;;  %s3057_s3 = inlined_call_operand.hbm [shape: f32[256,128], index: 3, kind: output, shape index: {}]  }
   0x1   :  { %v1930_v0 = vld [vmem:[%s3055_s1 + $0x78] sm:$0xff]   ;;  %v1934_v4 = vld [vmem:[%s3055_s1 + $0x70] sm:$0xff]   ;;  %v1938_v8 = vld [vmem:[%s3055_s1 + $0x68] sm:$0xff]  }
   0x2   :  { %v1931_v1 = vld [vmem:[%s3055_s1 + $0xf8] sm:$0xff]   ;;  %1703 = vmatprep.subr.bf16.mxu0 %v1930_v0  ;;  %v1935_v5 = vld [vmem:[%s3055_s1 + $0xf0] sm:$0xff]   ;;  %v1939_v9 = vld [vmem:[%s3055_s1 + $0xe8] sm:$0xff]  }
   0x3   :  { %v1932_v2 = vld [vmem:[%s3055_s1 + $0x38] sm:$0xff]   ;;  %1815 = vmatprep.subr.bf16.mxu1 %v1931_v1  ;;  %v1936_v6 = vld [vmem:[%s3055_s1 + $0x30] sm:$0xff]   ;;  %v1940_v10 = vld [vmem:[%s3055_s1 + $0x28] sm:$0xff]  }
   0x4   :  { %v1933_v3 = vld [vmem:[%s3055_s1 + $0xb8] sm:$0xff]   ;;  %1704 = vmatpush3.bf16.msra.mxu0 %v1932_v2  ;;  %v1937_v7 = vld [vmem:[%s3055_s1 + $0xb0] sm:$0xff]   ;;  %v1941_v11 = vld [vmem:[%s3055_s1 + $0xa8] sm:$0xff]  }
   0x5   :  { %1816 = vmatpush3.bf16.msra.mxu1 %v1933_v3  ;;  %1705 = vmatprep.subr.bf16.mxu0 %v1934_v4  ;;  %v1942_v12 = vld [vmem:[%s3055_s1 + $0x60] sm:$0xff]   ;;  %v1946_v16 = vld [vmem:[%s3055_s1 + $0x58] sm:$0xff]   ;;  %v1950_v20 = vld [vmem:[%s3055_s1 + $0x50] sm:$0xff]  }
   0x6   :  { %1817 = vmatprep.subr.bf16.mxu1 %v1935_v5  ;;  %v1943_v13 = vld [vmem:[%s3055_s1 + $0xe0] sm:$0xff]   ;;  %v1947_v17 = vld [vmem:[%s3055_s1 + $0xd8] sm:$0xff]   ;;  %v1951_v21 = vld [vmem:[%s3055_s1 + $0xd0] sm:$0xff]  }
   0x7   :  { %v1944_v14 = vld [vmem:[%s3055_s1 + $0x20] sm:$0xff]   ;;  %v1948_v18 = vld [vmem:[%s3055_s1 + $0x18] sm:$0xff]   ;;  %v1952_v22 = vld [vmem:[%s3055_s1 + $0x10] sm:$0xff]  }
   0x8   :  { %1706 = vmatpush3.bf16.msra.mxu0 %v1936_v6  ;;  %v1945_v15 = vld [vmem:[%s3055_s1 + $0xa0] sm:$0xff]   ;;  %v1949_v19 = vld [vmem:[%s3055_s1 + $0x98] sm:$0xff]   ;;  %v1953_v23 = vld [vmem:[%s3055_s1 + $0x90] sm:$0xff]  }
   0x9   :  { %1818 = vmatpush3.bf16.msra.mxu1 %v1937_v7  ;;  %1707 = vmatprep.subr.bf16.mxu0 %v1938_v8  ;;  %v1954_v24 = vld [vmem:[%s3055_s1 + $0x48] sm:$0xff]   ;;  %v1958_v28 = vld [vmem:[%s3055_s1 + $0x40] sm:$0xff]  }
   0xa   :  { %1819 = vmatprep.subr.bf16.mxu1 %v1939_v9  ;;  %v1955_v25 = vld [vmem:[%s3055_s1 + $0xc8] sm:$0xff]   ;;  %v1959_v29 = vld [vmem:[%s3055_s1 + $0xc0] sm:$0xff]  }
   0xb   :  { %v1956_v26 = vld [vmem:[%s3055_s1 + $0x8] sm:$0xff]   ;;  %v1960_v30 = vld [vmem:[%s3055_s1] sm:$0xff]  }
   0xc   :  { %1708 = vmatpush3.bf16.msra.mxu0 %v1940_v10  ;;  %v1957_v27 = vld [vmem:[%s3055_s1 + $0x88] sm:$0xff]   ;;  %v1961_v31 = vld [vmem:[%s3055_s1 + $0x80] sm:$0xff]  }
   0xd   :  { %1820 = vmatpush3.bf16.msra.mxu1 %v1941_v11  ;;  %1709 = vmatprep.subr.bf16.mxu0 %v1942_v12  ;;  %v1962_v32 = vld [vmem:[%s3054_s0] ss:$16 sps:$4 sm:$0xff]   ;;  %v1964_v33 = vld [vmem:[%s3054_s0 + $0x4] ss:$16 sps:$4 sm:$0xff]   ;;  %v1965_v34 = vld [vmem:[%s3054_s0 + $0x8] ss:$16 sps:$4 sm:$0xff]  }
   0xe   :  { %1821 = vmatprep.subr.bf16.mxu1 %v1943_v13  ;;  %v1967_v35 = vld [vmem:[%s3054_s0 + $0xc] ss:$16 sps:$4 sm:$0xff]   ;;  %756 = vmatprep.mubr.bf16.mxu0 %v1964_v33  ;;  %v1968_v36 = vld [vmem:[%s3054_s0 + $0x24] ss:$16 sps:$4 sm:$0xff]   ;;  %v1972_v38 = vld [vmem:[%s3054_s0 + $0x20] ss:$16 sps:$4 sm:$0xff]  }
   0xf   :  { %917 = vmatprep.mubr.bf16.mxu1 %v1967_v35  ;;  %v1970_v37 = vld [vmem:[%s3054_s0 + $0x2c] ss:$16 sps:$4 sm:$0xff]   ;;  %v1973_v39 = vld [vmem:[%s3054_s0 + $0x28] ss:$16 sps:$4 sm:$0xff]   ;;  %v1974_v40 = vld [vmem:[%s3054_s0 + $0x44] ss:$16 sps:$4 sm:$0xff]  }
  0x10   :  { %1710 = vmatpush3.bf16.msra.mxu0 %v1944_v14  ;;  %v1976_v41 = vld [vmem:[%s3054_s0 + $0x4c] ss:$16 sps:$4 sm:$0xff]   ;;  %v1978_v42 = vld [vmem:[%s3054_s0 + $0x40] ss:$16 sps:$4 sm:$0xff]   ;;  %v1979_v43 = vld [vmem:[%s3054_s0 + $0x48] ss:$16 sps:$4 sm:$0xff]  }
  0x11   :  { %1822 = vmatpush3.bf16.msra.mxu1 %v1945_v15  ;;  %1711 = vmatprep.subr.bf16.mxu0 %v1946_v16  ;;  %v1980_v44 = vld [vmem:[%s3054_s0 + $0x64] ss:$16 sps:$4 sm:$0xff]   ;;  %v1982_v45 = vld [vmem:[%s3054_s0 + $0x6c] ss:$16 sps:$4 sm:$0xff]   ;;  %v1984_v46 = vld [vmem:[%s3054_s0 + $0x60] ss:$16 sps:$4 sm:$0xff]  }
  0x12   :  { %1823 = vmatprep.subr.bf16.mxu1 %v1947_v17  ;;  %v1985_v47 = vld [vmem:[%s3054_s0 + $0x68] ss:$16 sps:$4 sm:$0xff]   ;;  %v1986_v48 = vld [vmem:[%s3054_s0 + $0x84] ss:$16 sps:$4 sm:$0xff]   ;;  %v1988_v49 = vld [vmem:[%s3054_s0 + $0x8c] ss:$16 sps:$4 sm:$0xff]  }
  0x13   :  { %v1990_v50 = vld [vmem:[%s3054_s0 + $0x80] ss:$16 sps:$4 sm:$0xff]   ;;  %v1991_v51 = vld [vmem:[%s3054_s0 + $0x88] ss:$16 sps:$4 sm:$0xff]   ;;  %v1992_v52 = vld [vmem:[%s3054_s0 + $0xa4] ss:$16 sps:$4 sm:$0xff]  }
  0x14   :  { %1712 = vmatpush3.bf16.msra.mxu0 %v1948_v18  ;;  %v1994_v53 = vld [vmem:[%s3054_s0 + $0xac] ss:$16 sps:$4 sm:$0xff]   ;;  %v1996_v54 = vld [vmem:[%s3054_s0 + $0xa0] ss:$16 sps:$4 sm:$0xff]   ;;  %v1997_v55 = vld [vmem:[%s3054_s0 + $0xa8] ss:$16 sps:$4 sm:$0xff]  }
  0x15   :  { %1824 = vmatpush3.bf16.msra.mxu1 %v1949_v19  ;;  %1713 = vmatprep.subr.bf16.mxu0 %v1950_v20  ;;  %v1998_v56 = vld [vmem:[%s3054_s0 + $0xc4] ss:$16 sps:$4 sm:$0xff]   ;;  %v2000_v57 = vld [vmem:[%s3054_s0 + $0xcc] ss:$16 sps:$4 sm:$0xff]  }
  0x16   :  { %1825 = vmatprep.subr.bf16.mxu1 %v1951_v21 }
  0x18   :  { %1714 = vmatpush3.bf16.msra.mxu0 %v1952_v22 }
  0x19   :  { %1826 = vmatpush3.bf16.msra.mxu1 %v1953_v23  ;;  %1715 = vmatprep.subr.bf16.mxu0 %v1954_v24 }
  0x1a   :  { %1827 = vmatprep.subr.bf16.mxu1 %v1955_v25 }
  0x1c   :  { %1716 = vmatpush3.bf16.msra.mxu0 %v1956_v26 }
  0x1d   :  { %1828 = vmatpush3.bf16.msra.mxu1 %v1957_v27  ;;  %1717 = vmatprep.subr.bf16.mxu0 %v1958_v28 }
  0x1e   :  { %1829 = vmatprep.subr.bf16.mxu1 %v1959_v29 }
  0x20   :  { %1718 = vmatpush3.bf16.msra.mxu0 %v1960_v30 }
  0x21   :  { %1830 = vmatpush3.bf16.msra.mxu1 %v1961_v31 }
  0x23   :  { %757 = vmatmul.mubr.bf16.vlgmr.msra.gmra.mxu0 %v1962_v32 }
  0x24   :  { %918 = vmatmul.mubr.bf16.vlgmr.msra.gmra.mxu1 %v1965_v34  ;;  %764 = vmatprep.mubr.bf16.mxu0 %v1968_v36 }
  0x25   :  { %925 = vmatprep.mubr.bf16.mxu1 %v1970_v37 }
  0x2b   :  { %765 = vmatmul.mubr.bf16.gmra.mxu0 %v1972_v38 }
  0x2c   :  { %926 = vmatmul.mubr.bf16.gmra.mxu1 %v1973_v39  ;;  %772 = vmatprep.mubr.bf16.mxu0 %v1974_v40 }
  0x2d   :  { %933 = vmatprep.mubr.bf16.mxu1 %v1976_v41 }
  0x33   :  { %773 = vmatmul.mubr.bf16.gmra.mxu0 %v1978_v42 }
  0x34   :  { %934 = vmatmul.mubr.bf16.gmra.mxu1 %v1979_v43  ;;  %780 = vmatprep.mubr.bf16.mxu0 %v1980_v44 }
  0x35   :  { %941 = vmatprep.mubr.bf16.mxu1 %v1982_v45 }
  0x3b   :  { %781 = vmatmul.mubr.bf16.gmra.mxu0 %v1984_v46 }
  0x3c   :  { %942 = vmatmul.mubr.bf16.gmra.mxu1 %v1985_v47  ;;  %788 = vmatprep.mubr.bf16.mxu0 %v1986_v48 }
  0x3d   :  { %949 = vmatprep.mubr.bf16.mxu1 %v1988_v49 }
  0x43   :  { %789 = vmatmul.mubr.bf16.gmra.mxu0 %v1990_v50 }
  0x44   :  { %950 = vmatmul.mubr.bf16.gmra.mxu1 %v1991_v51  ;;  %796 = vmatprep.mubr.bf16.mxu0 %v1992_v52 }
  0x45   :  { %957 = vmatprep.mubr.bf16.mxu1 %v1994_v53 }
  0x46   :  { %8 = vsyncpa [#allocation4], 0  ;;  %v2002_v58 = vld [vmem:[%s3054_s0 + $0xc0] ss:$16 sps:$4 sm:$0xff]   ;;  %v2003_v59 = vld [vmem:[%s3054_s0 + $0xc8] ss:$16 sps:$4 sm:$0xff]  }
  0x47   :  { %v2004_v60 = vld [vmem:[%s3054_s0 + $0xe4] ss:$16 sps:$4 sm:$0xff]   ;;  %v2006_v61 = vld [vmem:[%s3054_s0 + $0xec] ss:$16 sps:$4 sm:$0xff]   ;;  %v2008_v62 = vld [vmem:[%s3054_s0 + $0xe0] ss:$16 sps:$4 sm:$0xff]  }
  0x48   :  { %v2009_v63 = vld [vmem:[%s3054_s0 + $0xe8] ss:$16 sps:$4 sm:$0xff]   ;;  %v2010_v0 = vld [vmem:[%s3054_s0 + $0x104] ss:$16 sps:$4 sm:$0xff]   ;;  %v2012_v1 = vld [vmem:[%s3054_s0 + $0x10c] ss:$16 sps:$4 sm:$0xff]  }
  0x49   :  { %v2014_v2 = vld [vmem:[%s3054_s0 + $0x100] ss:$16 sps:$4 sm:$0xff]   ;;  %v2015_v3 = vld [vmem:[%s3054_s0 + $0x108] ss:$16 sps:$4 sm:$0xff]   ;;  %v2016_v4 = vld [vmem:[%s3054_s0 + $0x124] ss:$16 sps:$4 sm:$0xff]  }
  0x4a   :  { %v2018_v5 = vld [vmem:[%s3054_s0 + $0x12c] ss:$16 sps:$4 sm:$0xff]   ;;  %v2020_v6 = vld [vmem:[%s3054_s0 + $0x120] ss:$16 sps:$4 sm:$0xff]   ;;  %v2021_v7 = vld [vmem:[%s3054_s0 + $0x128] ss:$16 sps:$4 sm:$0xff]  }
  0x4b   :  { %797 = vmatmul.mubr.bf16.gmra.mxu0 %v1996_v54  ;;  %v2022_v8 = vld [vmem:[%s3054_s0 + $0x144] ss:$16 sps:$4 sm:$0xff]   ;;  %v2024_v9 = vld [vmem:[%s3054_s0 + $0x14c] ss:$16 sps:$4 sm:$0xff]   ;;  %v2026_v10 = vld [vmem:[%s3054_s0 + $0x140] ss:$16 sps:$4 sm:$0xff]  }
  0x4c   :  { %958 = vmatmul.mubr.bf16.gmra.mxu1 %v1997_v55  ;;  %804 = vmatprep.mubr.bf16.mxu0 %v1998_v56  ;;  %v2027_v11 = vld [vmem:[%s3054_s0 + $0x148] ss:$16 sps:$4 sm:$0xff]   ;;  %v2028_v12 = vld [vmem:[%s3054_s0 + $0x164] ss:$16 sps:$4 sm:$0xff]   ;;  %v2030_v13 = vld [vmem:[%s3054_s0 + $0x16c] ss:$16 sps:$4 sm:$0xff]  }
  0x4d   :  { %965 = vmatprep.mubr.bf16.mxu1 %v2000_v57  ;;  %v2032_v14 = vld [vmem:[%s3054_s0 + $0x160] ss:$16 sps:$4 sm:$0xff]   ;;  %v2033_v15 = vld [vmem:[%s3054_s0 + $0x168] ss:$16 sps:$4 sm:$0xff]   ;;  %v2034_v16 = vld [vmem:[%s3054_s0 + $0x184] ss:$16 sps:$4 sm:$0xff]  }
  0x4e   :  { %v2036_v17 = vld [vmem:[%s3054_s0 + $0x18c] ss:$16 sps:$4 sm:$0xff]   ;;  %v2038_v18 = vld [vmem:[%s3054_s0 + $0x180] ss:$16 sps:$4 sm:$0xff]   ;;  %v2039_v19 = vld [vmem:[%s3054_s0 + $0x188] ss:$16 sps:$4 sm:$0xff]  }
  0x4f   :  { %v2040_v20 = vld [vmem:[%s3054_s0 + $0x1a4] ss:$16 sps:$4 sm:$0xff]   ;;  %v2042_v21 = vld [vmem:[%s3054_s0 + $0x1ac] ss:$16 sps:$4 sm:$0xff]   ;;  %v2044_v22 = vld [vmem:[%s3054_s0 + $0x1a0] ss:$16 sps:$4 sm:$0xff]  }
  0x50   :  { %v2045_v23 = vld [vmem:[%s3054_s0 + $0x1a8] ss:$16 sps:$4 sm:$0xff]   ;;  %v2046_v24 = vld [vmem:[%s3054_s0 + $0x1c4] ss:$16 sps:$4 sm:$0xff]   ;;  %v2048_v25 = vld [vmem:[%s3054_s0 + $0x1cc] ss:$16 sps:$4 sm:$0xff]  }
  0x51   :  { %v2050_v26 = vld [vmem:[%s3054_s0 + $0x1c0] ss:$16 sps:$4 sm:$0xff]   ;;  %v2051_v27 = vld [vmem:[%s3054_s0 + $0x1c8] ss:$16 sps:$4 sm:$0xff]   ;;  %v2052_v28 = vld [vmem:[%s3054_s0 + $0x1e4] ss:$16 sps:$4 sm:$0xff]  }
  0x52   :  { %v2054_v29 = vld [vmem:[%s3054_s0 + $0x1ec] ss:$16 sps:$4 sm:$0xff]   ;;  %v2056_v30 = vld [vmem:[%s3054_s0 + $0x1e0] ss:$16 sps:$4 sm:$0xff]   ;;  %v2057_v31 = vld [vmem:[%s3054_s0 + $0x1e8] ss:$16 sps:$4 sm:$0xff]  }
  0x53   :  { %805 = vmatmul.mubr.bf16.gmra.mxu0 %v2002_v58 }
  0x54   :  { %966 = vmatmul.mubr.bf16.gmra.mxu1 %v2003_v59  ;;  %812 = vmatprep.mubr.bf16.mxu0 %v2004_v60 }
  0x55   :  { %973 = vmatprep.mubr.bf16.mxu1 %v2006_v61 }
  0x5b   :  { %813 = vmatmul.mubr.bf16.gmra.mxu0 %v2008_v62 }
  0x5c   :  { %974 = vmatmul.mubr.bf16.gmra.mxu1 %v2009_v63  ;;  %820 = vmatprep.mubr.bf16.mxu0 %v2010_v0 }
  0x5d   :  { %981 = vmatprep.mubr.bf16.mxu1 %v2012_v1 }
  0x63   :  { %821 = vmatmul.mubr.bf16.gmra.mxu0 %v2014_v2 }
  0x64   :  { %982 = vmatmul.mubr.bf16.gmra.mxu1 %v2015_v3  ;;  %828 = vmatprep.mubr.bf16.mxu0 %v2016_v4 }
  0x65   :  { %989 = vmatprep.mubr.bf16.mxu1 %v2018_v5 }
  0x6b   :  { %829 = vmatmul.mubr.bf16.gmra.mxu0 %v2020_v6 }
  0x6c   :  { %990 = vmatmul.mubr.bf16.gmra.mxu1 %v2021_v7  ;;  %836 = vmatprep.mubr.bf16.mxu0 %v2022_v8 }
  0x6d   :  { %997 = vmatprep.mubr.bf16.mxu1 %v2024_v9 }
  0x73   :  { %837 = vmatmul.mubr.bf16.gmra.mxu0 %v2026_v10 }
  0x74   :  { %998 = vmatmul.mubr.bf16.gmra.mxu1 %v2027_v11  ;;  %844 = vmatprep.mubr.bf16.mxu0 %v2028_v12 }
  0x75   :  { %1005 = vmatprep.mubr.bf16.mxu1 %v2030_v13 }
  0x7b   :  { %845 = vmatmul.mubr.bf16.gmra.mxu0 %v2032_v14 }
  0x7c   :  { %1006 = vmatmul.mubr.bf16.gmra.mxu1 %v2033_v15  ;;  %852 = vmatprep.mubr.bf16.mxu0 %v2034_v16 }
  0x7d   :  { %1013 = vmatprep.mubr.bf16.mxu1 %v2036_v17 }
  0x83   :  { %853 = vmatmul.mubr.bf16.gmra.mxu0 %v2038_v18 }
  0x84   :  { %1014 = vmatmul.mubr.bf16.gmra.mxu1 %v2039_v19  ;;  %860 = vmatprep.mubr.bf16.mxu0 %v2040_v20 }
  0x85   :  { %1021 = vmatprep.mubr.bf16.mxu1 %v2042_v21 }
  0x8b   :  { %861 = vmatmul.mubr.bf16.gmra.mxu0 %v2044_v22 }
  0x8c   :  { %1022 = vmatmul.mubr.bf16.gmra.mxu1 %v2045_v23  ;;  %868 = vmatprep.mubr.bf16.mxu0 %v2046_v24 }
  0x8d   :  { %1029 = vmatprep.mubr.bf16.mxu1 %v2048_v25 }
  0x93   :  { %869 = vmatmul.mubr.bf16.gmra.mxu0 %v2050_v26 }
  0x94   :  { %1030 = vmatmul.mubr.bf16.gmra.mxu1 %v2051_v27  ;;  %876 = vmatprep.mubr.bf16.mxu0 %v2052_v28 }
  0x95   :  { %1037 = vmatprep.mubr.bf16.mxu1 %v2054_v29 }
  0x9b   :  { %877 = vmatmul.mubr.bf16.gmra.mxu0 %v2056_v30 }
  0x9c   :  { %1038 = vmatmul.mubr.bf16.gmra.mxu1 %v2057_v31 }
  0xe3   :  { %v1719_v32 = vpop.f32.mrf.mxu0 }
  0xe4   :  { %v1831_v33 = vpop.f32.mrf.mxu1 }
  0xe5   :  { %v1720_v34 = vpop.f32.mrf.mxu0 }
  0xe6   :  { %v1721_v35 = vadd.f32 %v1720_v34, %v1719_v32  ;;  %v1832_v36 = vpop.f32.mrf.mxu1 }
  0xe7   :  { %v1833_v37 = vadd.f32 %v1832_v36, %v1831_v33  ;;  %v1722_v38 = vpop.f32.mrf.mxu0 }
  0xe8   :  { %v1834_v39 = vpop.f32.mrf.mxu1 }
  0xe9   :  { %v2457_v40 = vadd.f32 %v1833_v37, %v1721_v35  ;;  %v1723_v41 = vpop.f32.mrf.mxu0 }
  0xea   :  { %v1835_v42 = vpop.f32.mrf.mxu1  ;;  %v1724_v29 = vadd.f32 %v1723_v41, %v1722_v38 }
  0xeb   :  { %v1725_v43 = vpop.f32.mrf.mxu0  ;;  %v1836_v30 = vadd.f32 %v1835_v42, %v1834_v39 }
  0xec   :  { %v1837_v44 = vpop.f32.mrf.mxu1 }
  0xed   :  { %v1726_v45 = vpop.f32.mrf.mxu0  ;;  %v2527_v37 = vadd.f32 %v1836_v30, %v1724_v29 }
  0xee   :  { %v1838_v46 = vpop.f32.mrf.mxu1  ;;  %v1727_v33 = vadd.f32 %v1726_v45, %v1725_v43 }
  0xef   :  { %v1728_v47 = vpop.f32.mrf.mxu0  ;;  %v1839_v34 = vadd.f32 %v1838_v46, %v1837_v44  ;;  %v1184_v44 = vmul.f32 %v2527_v37, %v2527_v37 }
  0xf0   :  { %v1840_v48 = vpop.f32.mrf.mxu1 }
  0xf1   :  { %v1729_v49 = vpop.f32.mrf.mxu0  ;;  %v2533_v38 = vadd.f32 %v1839_v34, %v1727_v33 }
  0xf2   :  { %v1841_v50 = vpop.f32.mrf.mxu1 }
  0xf3   :  { %v1731_v51 = vpop.f32.mrf.mxu0 }
  0xf4   :  { %v1843_v52 = vpop.f32.mrf.mxu1 }
  0xf5   :  { %v1732_v53 = vpop.f32.mrf.mxu0 }
  0xf6   :  { %v1844_v54 = vpop.f32.mrf.mxu1  ;;  %v1733_v39 = vadd.f32 %v1732_v53, %v1731_v51  ;;  %v1185_v51 = vmul.f32 %v2533_v38, %v2533_v38 }
  0xf7   :  { %v1734_v55 = vpop.f32.mrf.mxu0  ;;  %v1845_v41 = vadd.f32 %v1844_v54, %v1843_v52 }
  0xf8   :  { %v1846_v56 = vpop.f32.mrf.mxu1 }
  0xf9   :  { %v1735_v57 = vpop.f32.mrf.mxu0  ;;  %v2551_v52 = vadd.f32 %v1845_v41, %v1733_v39 }
  0xfa   :  { %v1847_v58 = vpop.f32.mrf.mxu1  ;;  %v1736_v46 = vadd.f32 %v1735_v57, %v1734_v55  ;;  %v1145_v55 = vadd.f32 %v2527_v37, %v2457_v40 }
  0xfb   :  { %v1737_v59 = vpop.f32.mrf.mxu0  ;;  %v1187_v33 = vmul.f32 %v2551_v52, %v2551_v52 }
  0xfc   :  { %v1849_v60 = vpop.f32.mrf.mxu1 }
  0xfd   :  { %v1738_v61 = vpop.f32.mrf.mxu0 }
  0xfe   :  { %v1850_v62 = vpop.f32.mrf.mxu1  ;;  %v1739_v53 = vadd.f32 %v1738_v61, %v1737_v59  ;;  %v1146_v61 = vadd.f32 %v1145_v55, %v2533_v38 }
  0xff   :  { %v2459_v63 = vpop.f32.mrf.mxu0  ;;  %v1851_v54 = vadd.f32 %v1850_v62, %v1849_v60 }
 0x100   :  { %v2461_v0 = vpop.f32.mrf.mxu1 }
 0x101   :  { %v2463_v1 = vpop.f32.mrf.mxu0  ;;  %v2574_v34 = vadd.f32 %v1851_v54, %v1739_v53 }
 0x102   :  { %v2465_v2 = vpop.f32.mrf.mxu1  ;;  %v1742_v30 = vadd.f32 %v2463_v1, %v2459_v63 }
 0x103   :  { %v2467_v3 = vpop.f32.mrf.mxu0  ;;  %v1854_v59 = vadd.f32 %v2465_v2, %v2461_v0 }
 0x104   :  { %v2469_v4 = vpop.f32.mrf.mxu1 }
 0x105   :  { %v2471_v5 = vpop.f32.mrf.mxu0 }
 0x106   :  { %v2473_v6 = vpop.f32.mrf.mxu1  ;;  %v1745_v41 = vadd.f32 %v2471_v5, %v2467_v3 }
 0x107   :  { %v2475_v7 = vpop.f32.mrf.mxu0  ;;  %v1857_v63 = vadd.f32 %v2473_v6, %v2469_v4 }
 0x108   :  { %v2477_v8 = vpop.f32.mrf.mxu1 }
 0x109   :  { %v2479_v9 = vpop.f32.mrf.mxu0  ;;  %v2602_v54 = vadd.f32 %v1857_v63, %v1745_v41 }
 0x10a   :  { %v2481_v10 = vpop.f32.mrf.mxu1 }
 0x10b   :  { %v2483_v11 = vpop.f32.mrf.mxu0  ;;  %v1860_v3 = vadd.f32 %v2481_v10, %v2477_v8 }
 0x10c   :  { %v2485_v12 = vpop.f32.mrf.mxu1 }
 0x10d   :  { %v2487_v13 = vpop.f32.mrf.mxu0 }
 0x10e   :  { %v2489_v14 = vpop.f32.mrf.mxu1  ;;  %v1751_v55 = vadd.f32 %v2487_v13, %v2483_v11 }
 0x10f   :  { %v2491_v15 = vpop.f32.mrf.mxu0 }
 0x110   :  { %v2493_v16 = vpop.f32.mrf.mxu1 }
 0x111   :  { %v2495_v17 = vpop.f32.mrf.mxu0 }
 0x112   :  { %v2497_v18 = vpop.f32.mrf.mxu1 }
 0x113   :  { %v2499_v19 = vpop.f32.mrf.mxu0  ;;  %v1866_v11 = vadd.f32 %v2497_v18, %v2493_v16 }
 0x114   :  { %v2501_v20 = vpop.f32.mrf.mxu1 }
 0x115   :  { %v2503_v21 = vpop.f32.mrf.mxu0 }
 0x116   :  { %v2505_v22 = vpop.f32.mrf.mxu1  ;;  %v1757_v41 = vadd.f32 %v2503_v21, %v2499_v19 }
 0x117   :  { %v2507_v23 = vpop.f32.mrf.mxu0 }
 0x118   :  { %v2509_v24 = vpop.f32.mrf.mxu1 }
 0x119   :  { %3058 = vst [vmem:[#allocation6_spill] sm:$0xff] %v2509_v24  ;;  %v2511_v25 = vpop.f32.mrf.mxu0  ;;  %v1730_v24 = vadd.f32 %v1729_v49, %v1728_v47  ;;  %v1848_v47 = vadd.f32 %v1847_v58, %v1846_v56  ;;  %v1183_v49 = vmul.f32 %v2457_v40, %v2457_v40 }
 0x11a   :  { %3059 = vst [vmem:[#allocation7_spill] sm:$0xff] %v2511_v25  ;;  %v2513_v26 = vpop.f32.mrf.mxu1 }
 0x11b   :  { %3060 = vst [vmem:[#allocation8_spill] sm:$0xff] %v2513_v26  ;;  %v2515_v27 = vpop.f32.mrf.mxu0  ;;  %v1842_v26 = vadd.f32 %v1841_v50, %v1840_v48  ;;  %v1215_v56 = vadd.f32 %v1184_v44, %v1183_v49  ;;  %v2561_v58 = vadd.f32 %v1848_v47, %v1736_v46  ;;  %v2589_v47 = vadd.f32 %v1854_v59, %v1742_v30 }
 0x11c   :  { %3061 = vst [vmem:[#allocation9_spill] sm:$0xff] %v2515_v27  ;;  %v2517_v28 = vpop.f32.mrf.mxu1  ;;  %v1748_v49 = vadd.f32 %v2479_v9, %v2475_v7  ;;  %v1863_v7 = vadd.f32 %v2489_v14, %v2485_v12  ;;  %v1754_v59 = vadd.f32 %v2495_v17, %v2491_v15  ;;  %v1869_v15 = vadd.f32 %v2505_v22, %v2501_v20 }
 0x11d   :  { %v2519_v31 = vpop.f32.mrf.mxu0  ;;  %v2541_v45 = vadd.f32 %v1842_v26, %v1730_v24  ;;  %v1216_v62 = vadd.f32 %v1215_v56, %v1185_v51  ;;  %v1188_v44 = vmul.f32 %v2561_v58, %v2561_v58  ;;  %v1189_v51 = vmul.f32 %v2574_v34, %v2574_v34 }
 0x11e   :  { %v2521_v32 = vpop.f32.mrf.mxu1  ;;  %v2615_v30 = vadd.f32 %v1860_v3, %v1748_v49 }
 0x11f   :  { %v2523_v35 = vpop.f32.mrf.mxu0  ;;  %v1186_v57 = vmul.f32 %v2541_v45, %v2541_v45  ;;  %v1147_v0 = vadd.f32 %v1146_v61, %v2541_v45 }
 0x120   :  { %v2525_v36 = vpop.f32.mrf.mxu1  ;;  %v3063_v19 = vld [vmem:[#allocation6_spill] sm:$0xff] }
 0x121   :  { %v2529_v25 = vpop.f32.mrf.mxu0  ;;  %v1217_v2 = vadd.f32 %v1216_v62, %v1186_v57  ;;  %v1148_v4 = vadd.f32 %v1147_v0, %v2551_v52  ;;  %v1190_v57 = vmul.f32 %v2589_v47, %v2589_v47  ;;  %v1191_v62 = vmul.f32 %v2602_v54, %v2602_v54  ;;  %v3062_v49 = vld [vmem:[#allocation7_spill] sm:$0xff] }
 0x122   :  { %v2531_v27 = vpop.f32.mrf.mxu1  ;;  %v1192_v0 = vmul.f32 %v2615_v30, %v2615_v30  ;;  %v1760_v3 = vadd.f32 %v3062_v49, %v2507_v23  ;;  %v3064_v21 = vld [vmem:[#allocation8_spill] sm:$0xff]  ;;  %v1875_v23 = vadd.f32 %v2521_v32, %v2517_v28 }
 0x123   :  { %v2535_v42 = vpop.f32.mrf.mxu0  ;;  %v1218_v6 = vadd.f32 %v1217_v2, %v1187_v33  ;;  %v1149_v8 = vadd.f32 %v1148_v4, %v2561_v58  ;;  %v2628_v33 = vadd.f32 %v1863_v7, %v1751_v55  ;;  %v2641_v2 = vadd.f32 %v1866_v11, %v1754_v59 }
 0x124   :  { %v2537_v43 = vpop.f32.mrf.mxu1  ;;  %v1872_v4 = vadd.f32 %v3064_v21, %v3063_v19  ;;  %v2652_v55 = vadd.f32 %v1869_v15, %v1757_v41  ;;  %v1766_v41 = vadd.f32 %v2529_v25, %v2523_v35  ;;  %v1878_v15 = vadd.f32 %v2531_v27, %v2525_v36 }
 0x125   :  { %v2543_v48 = vpop.f32.mrf.mxu0  ;;  %v1219_v10 = vadd.f32 %v1218_v6, %v1188_v44  ;;  %v1150_v12 = vadd.f32 %v1149_v8, %v2574_v34  ;;  %v3065_v8 = vld [vmem:[#allocation9_spill] sm:$0xff] }
 0x126   :  { %v2547_v50 = vpop.f32.mrf.mxu1  ;;  %v1195_v32 = vmul.f32 %v2652_v55, %v2652_v55  ;;  %v1769_v49 = vadd.f32 %v2543_v48, %v2535_v42  ;;  %v2679_v21 = vadd.f32 %v1878_v15, %v1766_v41 }
 0x127   :  { %v2553_v29 = vpop.f32.mrf.mxu0  ;;  %v1220_v14 = vadd.f32 %v1219_v10, %v1189_v51  ;;  %v1151_v18 = vadd.f32 %v1150_v12, %v2589_v47  ;;  %v1193_v51 = vmul.f32 %v2628_v33, %v2628_v33  ;;  %v1763_v10 = vadd.f32 %v2519_v31, %v3065_v8 }
 0x128   :  { %v2555_v24 = vpop.f32.mrf.mxu1  ;;  %v1194_v12 = vmul.f32 %v2641_v2, %v2641_v2 }
 0x129   :  { %v2563_v26 = vpop.f32.mrf.mxu0  ;;  %v1221_v63 = vadd.f32 %v1220_v14, %v1190_v57  ;;  %v1152_v22 = vadd.f32 %v1151_v18, %v2602_v54 }
 0x12a   :  { %v2569_v60 = vpop.f32.mrf.mxu1 }
 0x12b   :  { %v2576_v39 = vpop.f32.mrf.mxu0  ;;  %v1222_v6 = vadd.f32 %v1221_v63, %v1191_v62  ;;  %v1153_v59 = vadd.f32 %v1152_v22, %v2615_v30  ;;  %v2661_v62 = vadd.f32 %v1872_v4, %v1760_v3  ;;  %v1881_v3 = vadd.f32 %v2547_v50, %v2537_v43 }
 0x12c   :  { %v2582_v1 = vpop.f32.mrf.mxu1  ;;  %v1772_v4 = vadd.f32 %v2563_v26, %v2553_v29  ;;  %v1884_v22 = vadd.f32 %v2569_v60, %v2555_v24 }
 0x12d   :  { %v2587_v46 = vpop.f32.mrf.mxu0  ;;  %v1223_v11 = vadd.f32 %v1222_v6, %v1192_v0  ;;  %v1154_v18 = vadd.f32 %v1153_v59, %v2628_v33  ;;  %v2670_v0 = vadd.f32 %v1875_v23, %v1763_v10  ;;  %v1196_v19 = vmul.f32 %v2661_v62, %v2661_v62 }
 0x12e   :  { %v2595_v5 = vpop.f32.mrf.mxu1  ;;  %v1775_v8 = vadd.f32 %v2587_v46, %v2576_v39  ;;  %v1198_v23 = vmul.f32 %v2679_v21, %v2679_v21  ;;  %v2697_v59 = vadd.f32 %v1884_v22, %v1772_v4 }
 0x12f   :  { %v2600_v53 = vpop.f32.mrf.mxu0  ;;  %v1224_v28 = vadd.f32 %v1223_v11, %v1193_v51  ;;  %v1155_v35 = vadd.f32 %v1154_v18, %v2641_v2  ;;  %v1197_v6 = vmul.f32 %v2670_v0, %v2670_v0  ;;  %v2688_v51 = vadd.f32 %v1881_v3, %v1769_v49 }
 0x130   :  { %v2608_v9 = vpop.f32.mrf.mxu1  ;;  %v1887_v10 = vadd.f32 %v2595_v5, %v2582_v1 }
 0x131   :  { %v2611_v56 = vpop.f32.mrf.mxu0  ;;  %v1225_v27 = vadd.f32 %v1224_v28, %v1194_v12  ;;  %v1156_v48 = vadd.f32 %v1155_v35, %v2652_v55  ;;  %v1199_v41 = vmul.f32 %v2688_v51, %v2688_v51 }
 0x132   :  { %v2621_v13 = vpop.f32.mrf.mxu1  ;;  %v1778_v12 = vadd.f32 %v2611_v56, %v2600_v53  ;;  %v2706_v15 = vadd.f32 %v1887_v10, %v1775_v8 }
 0x133   :  { %v2624_v61 = vpop.f32.mrf.mxu0  ;;  %v1226_v43 = vadd.f32 %v1225_v27, %v1195_v32  ;;  %v1157_v24 = vadd.f32 %v1156_v48, %v2661_v62  ;;  %v1890_v39 = vadd.f32 %v2621_v13, %v2608_v9  ;;  %v1200_v9 = vmul.f32 %v2697_v59, %v2697_v59 }
 0x134   :  { %v2634_v17 = vpop.f32.mrf.mxu1 }
 0x135   :  { %v2636_v16 = vpop.f32.mrf.mxu0  ;;  %v1227_v60 = vadd.f32 %v1226_v43, %v1196_v19  ;;  %v1158_v1 = vadd.f32 %v1157_v24, %v2670_v0  ;;  %v2714_v3 = vadd.f32 %v1890_v39, %v1778_v12 }
 0x136   :  { %v1892_v44 = vpop.f32.mrf.mxu1  ;;  %v1781_v28 = vadd.f32 %v2636_v16, %v2624_v61  ;;  %v1201_v61 = vmul.f32 %v2706_v15, %v2706_v15 }
 0x137   :  { %v2647_v20 = vpop.f32.mrf.mxu0  ;;  %v1228_v5 = vadd.f32 %v1227_v60, %v1197_v6  ;;  %v1893_v32 = vadd.f32 %v1892_v44, %v2634_v17  ;;  %v1159_v53 = vadd.f32 %v1158_v1, %v2679_v21 }
 0x138   :  { %v1894_v7 = vpop.f32.mrf.mxu1 }
 0x139   :  { %v1783_v57 = vpop.f32.mrf.mxu0  ;;  %v1229_v56 = vadd.f32 %v1228_v5, %v1198_v23  ;;  %v1160_v4 = vadd.f32 %v1159_v53, %v2688_v51  ;;  %v2720_v16 = vadd.f32 %v1893_v32, %v1781_v28 }
 0x13a   :  { %v1895_v14 = vpop.f32.mrf.mxu1  ;;  %v1784_v35 = vadd.f32 %v1783_v57, %v2647_v20  ;;  %v1202_v20 = vmul.f32 %v2714_v3, %v2714_v3 }
 0x13b   :  { %v1785_v31 = vpop.f32.mrf.mxu0  ;;  %v1896_v27 = vadd.f32 %v1895_v14, %v1894_v7  ;;  %v1230_v22 = vadd.f32 %v1229_v56, %v1199_v41  ;;  %v1161_v6 = vadd.f32 %v1160_v4, %v2697_v59 }
 0x13c   :  { %v1897_v63 = vpop.f32.mrf.mxu1 }
 0x13d   :  { %v1786_v25 = vpop.f32.mrf.mxu0  ;;  %v1231_v8 = vadd.f32 %v1230_v22, %v1200_v9  ;;  %v2725_v7 = vadd.f32 %v1896_v27, %v1784_v35  ;;  %v1162_v60 = vadd.f32 %v1161_v6, %v2706_v15 }
 0x13e   :  { %v1898_v36 = vpop.f32.mrf.mxu1  ;;  %v1787_v44 = vadd.f32 %v1786_v25, %v1785_v31  ;;  %v1203_v31 = vmul.f32 %v2720_v16, %v2720_v16 }
 0x13f   :  { %v1788_v42 = vpop.f32.mrf.mxu0  ;;  %v1899_v48 = vadd.f32 %v1898_v36, %v1897_v63  ;;  %v1232_v23 = vadd.f32 %v1231_v8, %v1201_v61  ;;  %v1163_v1 = vadd.f32 %v1162_v60, %v2714_v3 }
 0x140   :  { %v1900_v50 = vpop.f32.mrf.mxu1 }
 0x141   :  { %v1789_v29 = vpop.f32.mrf.mxu0  ;;  %v2730_v63 = vadd.f32 %v1899_v48, %v1787_v44  ;;  %v1233_v41 = vadd.f32 %v1232_v23, %v1202_v20 }
 0x142   :  { %v1901_v26 = vpop.f32.mrf.mxu1  ;;  %v1790_v57 = vadd.f32 %v1789_v29, %v1788_v42  ;;  %v1204_v42 = vmul.f32 %v2725_v7, %v2725_v7 }
 0x143   :  { %v1791_v11 = vpop.f32.mrf.mxu0  ;;  %v1902_v14 = vadd.f32 %v1901_v26, %v1900_v50  ;;  %v1164_v26 = vadd.f32 %v1163_v1, %v2720_v16  ;;  %v1234_v56 = vadd.f32 %v1233_v41, %v1203_v31 }
 0x144   :  { %v1903_v46 = vpop.f32.mrf.mxu1 }
 0x145   :  { %v1792_v18 = vpop.f32.mrf.mxu0  ;;  %v2735_v50 = vadd.f32 %v1902_v14, %v1790_v57  ;;  %v1235_v4 = vadd.f32 %v1234_v56, %v1204_v42 }
 0x146   :  { %v1904_v49 = vpop.f32.mrf.mxu1  ;;  %v1793_v25 = vadd.f32 %v1792_v18, %v1791_v11  ;;  %v1205_v11 = vmul.f32 %v2730_v63, %v2730_v63 }
 0x147   :  { %v1794_v13 = vpop.f32.mrf.mxu0  ;;  %v1905_v36 = vadd.f32 %v1904_v49, %v1903_v46  ;;  %v1165_v49 = vadd.f32 %v1164_v26, %v2725_v7  ;;  %v1206_v22 = vmul.f32 %v2735_v50, %v2735_v50 }
 0x148   :  { %v1906_v19 = vpop.f32.mrf.mxu1 }
 0x149   :  { %v1795_v17 = vpop.f32.mrf.mxu0  ;;  %v2740_v46 = vadd.f32 %v1905_v36, %v1793_v25 }
 0x14a   :  { %v1907_v43 = vpop.f32.mrf.mxu1  ;;  %v1796_v28 = vadd.f32 %v1795_v17, %v1794_v13  ;;  %v1166_v13 = vadd.f32 %v1165_v49, %v2730_v63 }
 0x14b   :  { %v1797_v10 = vpop.f32.mrf.mxu0  ;;  %v1908_v32 = vadd.f32 %v1907_v43, %v1906_v19  ;;  %v1236_v43 = vadd.f32 %v1235_v4, %v1205_v11  ;;  %v1207_v6 = vmul.f32 %v2740_v46, %v2740_v46 }
 0x14c   :  { %v1909_v24 = vpop.f32.mrf.mxu1 }
 0x14d   :  { %v1798_v12 = vpop.f32.mrf.mxu0  ;;  %v2746_v19 = vadd.f32 %v1908_v32, %v1796_v28  ;;  %v1237_v60 = vadd.f32 %v1236_v43, %v1206_v22 }
 0x14e   :  { %v1910_v39 = vpop.f32.mrf.mxu1  ;;  %v1799_v9 = vadd.f32 %v1798_v12, %v1797_v10  ;;  %v1167_v10 = vadd.f32 %v1166_v13, %v2735_v50 }
 0x14f   :  { %v1800_v5 = vpop.f32.mrf.mxu0  ;;  %v1911_v35 = vadd.f32 %v1910_v39, %v1909_v24  ;;  %v1208_v31 = vmul.f32 %v2746_v19, %v2746_v19  ;;  %v1238_v39 = vadd.f32 %v1237_v60, %v1207_v6 }
 0x150   :  { %v1912_v29 = vpop.f32.mrf.mxu1  ;;  %v1168_v12 = vadd.f32 %v1167_v10, %v2740_v46 }
 0x151   :  { %v1801_v53 = vpop.f32.mrf.mxu0  ;;  %v2751_v20 = vadd.f32 %v1911_v35, %v1799_v9 }
 0x152   :  { %v1913_v18 = vpop.f32.mrf.mxu1  ;;  %v1802_v17 = vadd.f32 %v1801_v53, %v1800_v5  ;;  %v1169_v41 = vadd.f32 %v1168_v12, %v2746_v19  ;;  %v1239_v53 = vadd.f32 %v1238_v39, %v1208_v31 }
 0x153   :  { %v1803_v27 = vpop.f32.mrf.mxu0  ;;  %v1914_v44 = vadd.f32 %v1913_v18, %v1912_v29  ;;  %v1209_v42 = vmul.f32 %v2751_v20, %v2751_v20 }
 0x154   :  { %v1915_v61 = vpop.f32.mrf.mxu1  ;;  %v1170_v56 = vadd.f32 %v1169_v41, %v2751_v20 }
 0x155   :  { %v1804_v48 = vpop.f32.mrf.mxu0  ;;  %v2756_v25 = vadd.f32 %v1914_v44, %v1802_v17 }
 0x156   :  { %v1916_v8 = vpop.f32.mrf.mxu1  ;;  %v1805_v57 = vadd.f32 %v1804_v48, %v1803_v27  ;;  %v1240_v27 = vadd.f32 %v1239_v53, %v1209_v42 }
 0x157   :  { %v1917_v14 = vadd.f32 %v1916_v8, %v1915_v61  ;;  %v1806_v24 = vpop.f32.mrf.mxu0  ;;  %v1210_v11 = vmul.f32 %v2756_v25, %v2756_v25  ;;  %v1171_v4 = vadd.f32 %v1170_v56, %v2756_v25 }
 0x158   :  { %v1918_v23 = vpop.f32.mrf.mxu1 }
 0x159   :  { %v1807_v36 = vpop.f32.mrf.mxu0  ;;  %v2761_v29 = vadd.f32 %v1917_v14, %v1805_v57  ;;  %v1241_v44 = vadd.f32 %v1240_v27, %v1210_v11 }
 0x15a   :  { %v1808_v1 = vadd.f32 %v1807_v36, %v1806_v24  ;;  %v1919_v5 = vpop.f32.mrf.mxu1 }
 0x15b   :  { %v1920_v26 = vadd.f32 %v1919_v5, %v1918_v23  ;;  %v1809_v28 = vpop.f32.mrf.mxu0  ;;  %v1211_v22 = vmul.f32 %v2761_v29, %v2761_v29  ;;  %v1172_v48 = vadd.f32 %v1171_v4, %v2761_v29 }
 0x15c   :  { %v1921_v32 = vpop.f32.mrf.mxu1 }
 0x15d   :  { %v2766_v18 = vadd.f32 %v1920_v26, %v1808_v1  ;;  %v1810_v49 = vpop.f32.mrf.mxu0  ;;  %v1242_v14 = vadd.f32 %v1241_v44, %v1211_v22 }
 0x15e   :  { %v1811_v9 = vadd.f32 %v1810_v49, %v1809_v28  ;;  %v1922_v35 = vpop.f32.mrf.mxu1 }
 0x15f   :  { %v1923_v61 = vadd.f32 %v1922_v35, %v1921_v32  ;;  %v1812_v13 = vpop.f32.mrf.mxu0  ;;  %v1212_v43 = vmul.f32 %v2766_v18, %v2766_v18  ;;  %v1173_v24 = vadd.f32 %v1172_v48, %v2766_v18 }
 0x160   :  { %v1924_v17 = vpop.f32.mrf.mxu1 }
 0x161   :  { %v2774_v6 = vadd.f32 %v1923_v61, %v1811_v9  ;;  %v1813_v8 = vpop.f32.mrf.mxu0  ;;  %v1243_v12 = vadd.f32 %v1242_v14, %v1212_v43  ;;  %v1263_v43 = vlaneseq }
 0x162   :  { %v1814_v10 = vadd.f32 %v1813_v8, %v1812_v13  ;;  %v1925_v57 = vpop.f32.mrf.mxu1 }
 0x163   :  { %v1213_v60 = vmul.f32 %v2774_v6, %v2774_v6  ;;  %v1926_v23 = vadd.f32 %v1925_v57, %v1924_v17  ;;  %v1174_v31 = vadd.f32 %v1173_v24, %v2774_v6  ;;  %v1264_v8 = vshrl.u32 %v1263_v43, 7 }
 0x165   :  { %v2780_v36 = vadd.f32 %v1926_v23, %v1814_v10  ;;  %v1244_v39 = vadd.f32 %v1243_v12, %v1213_v60  ;;  %v1256_v10 = vld [vmem:[%s3056_s2] sm:$0x1]  ;;  %v1265_v57 = vsub.s32 0, %v1264_v8  ;;  %v1260_v60 = vld [vmem:[%s3056_s2 + $0x1] sm:$0x1]  ;;  %s2146_s2 = smov [#allocation3]  }
 0x166   :  { %s1596_s13 = sshll.u32 %s2146_s2, 4  ;;  %s1597_s13 = int_to_ptr.vmem [resolvable:$true] %s1596_s13 }
 0x167   :  { %v1175_v1 = vadd.f32 %v1174_v31, %v2780_v36  ;;  %v1214_v5 = vmul.f32 %v2780_v36, %v2780_v36  ;;  %s2124_s14 = scalar_lea.vmem %s1597_s13, 4096  ;;  %p2129_p1 = scmp.lt.s32.totalorder %s1597_s13, %s1597_s13 }
 0x168   :  { %p2125_p0 = scmp.ne.s32.totalorder %s1597_s13, %s2124_s14  ;;  %p2130_p2 = scmp.lt.s32.totalorder %s2124_s14, %s2124_s14 }
 0x169   :  { %v1176_v41 = vrot.slane %v1175_v1, 4  ;;  %v1245_v42 = vadd.f32 %v1244_v39, %v1214_v5 }
 0x16a   :  { %p2131_p3 = por %p2130_p2, %p2129_p1 }
 0x16b   :  { %v1177_v26 = vadd.f32 %v1176_v41, %v1175_v1  ;;  %v1246_v28 = vrot.slane %v1245_v42, 4 }
 0x16c   :  { %p2132_p4 = pnand %p2131_p3, %p2125_p0 }
 0x16d   :  { %v1178_v32 = vrot.slane %v1177_v26, 2  ;;  %v1247_v53 = vadd.f32 %v1246_v28, %v1245_v42 }
 0x16f   :  { %v1179_v56 = vadd.f32 %v1178_v32, %v1177_v26  ;;  %v1248_v11 = vrot.slane %v1247_v53, 2 }
 0x171   :  { %v1180_v49 = vrot.slane %v1179_v56, 1  ;;  %v1249_v9 = vadd.f32 %v1248_v11, %v1247_v53 }
 0x173   :  { %v1181_v35 = vadd.f32 %v1180_v49, %v1179_v56  ;;  %v1250_v27 = vrot.slane %v1249_v9, 1 }
 0x175   :  { %v1182_v4 = vmul.f32 0.00390625, %v1181_v35  ;;  %v1251_v22 = vadd.f32 %v1250_v27, %v1249_v9 }
 0x177   :  { %v1252_v61 = vmul.f32 0.00390625, %v1251_v22  ;;  %v1253_v13 = vmul.f32 %v1182_v4, %v1182_v4 }
 0x179   :  { %v1254_v17 = vsub.f32 %v1252_v61, %v1253_v13 }
 0x17b   :  { %v1255_v44 = vmax.f32 %v1254_v17, 0.0 }
 0x17d   :  { %v1257_v48 = vadd.f32 1e-05, %v1255_v44 }
 0x17f   :  { %2058 = vrsqrt.f32 %v1257_v48 }
 0x18c   :  { %v2059_v14 = vpop.eup %2058 }
 0x18d   :  { %v1259_v24 = vmul.f32 %v2059_v14, %v1256_v10 }
 0x18f   :  { %v1261_v23 = vmul.f32 %v1259_v24, %v1182_v4  ;;  %v2791_v12 = vrot.slane %v1259_v24, %v1265_v57 }
 0x191   :  { %v1262_v31 = vsub.f32 %v1260_v60, %v1261_v23  ;;  %v1269_v39 = vmul.f32 %v2791_v12, %v2533_v38  ;;  %v1267_v5 = vmul.f32 %v2791_v12, %v2457_v40  ;;  %v1270_v41 = vmul.f32 %v2791_v12, %v2541_v45 }
 0x192   :  { %v1268_v42 = vmul.f32 %v2791_v12, %v2527_v37  ;;  %v1272_v38 = vmul.f32 %v2791_v12, %v2561_v58  ;;  %v1271_v40 = vmul.f32 %v2791_v12, %v2551_v52  ;;  %v1274_v52 = vmul.f32 %v2791_v12, %v2589_v47 }
 0x193   :  { %v2795_v1 = vrot.slane %v1262_v31, %v1265_v57  ;;  %v1273_v27 = vmul.f32 %v2791_v12, %v2574_v34  ;;  %v1276_v34 = vmul.f32 %v2791_v12, %v2615_v30  ;;  %v1275_v47 = vmul.f32 %v2791_v12, %v2602_v54 }
 0x194   :  { %v1278_v30 = vmul.f32 %v2791_v12, %v2641_v2  ;;  %v1277_v54 = vmul.f32 %v2791_v12, %v2628_v33  ;;  %v1280_v2 = vmul.f32 %v2791_v12, %v2661_v62  ;;  %v1279_v33 = vmul.f32 %v2791_v12, %v2652_v55 }
 0x195   :  { %v1305_v26 = vadd.f32 %v2795_v1, %v1269_v39  ;;  %v1303_v28 = vadd.f32 %v2795_v1, %v1267_v5  ;;  %v1306_v32 = vadd.f32 %v2795_v1, %v1270_v41  ;;  %v1304_v53 = vadd.f32 %v2795_v1, %v1268_v42 }
 0x196   :  { %v1308_v37 = vadd.f32 %v2795_v1, %v1272_v38  ;;  %v1307_v11 = vadd.f32 %v2795_v1, %v1271_v40  ;;  %v1310_v4 = vadd.f32 %v2795_v1, %v1274_v52  ;;  %v1309_v22 = vadd.f32 %v2795_v1, %v1273_v27 }
 0x197   :  { %v2811_v56 = vmax.f32 %v1305_v26, 0.0  ;;  %v2813_v45 = vmax.f32 %v1303_v28, 0.0  ;;  %v2821_v35 = vmax.f32 %v1306_v32, 0.0  ;;  %v2823_v58 = vmax.f32 %v1304_v53, 0.0 }
 0x198   :  { %v2835_v17 = vmax.f32 %v1308_v37, 0.0  ;;  %v2837_v44 = vmax.f32 %v1307_v11, 0.0  ;;  %v2843_v48 = vmax.f32 %v1310_v4, 0.0  ;;  %v2845_v43 = vmax.f32 %v1309_v22, 0.0 }
 0x199   :  { %v1369_v49 = vmul.f32 %v2811_v56, %v2811_v56  ;;  %v1367_v9 = vmul.f32 %v2813_v45, %v2813_v45  ;;  %v1370_v61 = vmul.f32 %v2821_v35, %v2821_v35  ;;  %v1368_v13 = vmul.f32 %v2823_v58, %v2823_v58 }
 0x19a   :  { %v1372_v8 = vmul.f32 %v2835_v17, %v2835_v17  ;;  %v1371_v10 = vmul.f32 %v2837_v44, %v2837_v44  ;;  %v1312_v57 = vadd.f32 %v2795_v1, %v1276_v34  ;;  %v1311_v14 = vadd.f32 %v2795_v1, %v1275_v47 }
 0x19b   :  { %1403 = vadd.xlane.f32.xlu1 %v1369_v49  ;;  %1399 = vadd.xlane.f32.xlu0 %v1367_v9  ;;  %v1374_v24 = vmul.f32 %v2843_v48, %v2843_v48  ;;  %v1373_v60 = vmul.f32 %v2845_v43, %v2845_v43  ;;  %v1314_v39 = vadd.f32 %v2795_v1, %v1278_v30 }
 0x19c   :  { %v2861_v23 = vmax.f32 %v1312_v57, 0.0  ;;  %v2863_v31 = vmax.f32 %v1311_v14, 0.0  ;;  %v1313_v5 = vadd.f32 %v2795_v1, %v1277_v54  ;;  %v1316_v41 = vadd.f32 %v2795_v1, %v1280_v2 }
 0x19d   :  { %v1315_v42 = vadd.f32 %v2795_v1, %v1279_v33  ;;  %v2877_v32 = vmax.f32 %v1314_v39, 0.0  ;;  %v1282_v62 = vmul.f32 %v2791_v12, %v2679_v21  ;;  %v1281_v55 = vmul.f32 %v2791_v12, %v2670_v0 }
 0x19e   :  { %v1376_v26 = vmul.f32 %v2861_v23, %v2861_v23  ;;  %v1375_v28 = vmul.f32 %v2863_v31, %v2863_v31  ;;  %v2879_v53 = vmax.f32 %v1313_v5, 0.0  ;;  %v2885_v38 = vmax.f32 %v1316_v41, 0.0 }
 0x19f   :  { %1405 = vadd.xlane.f32.xlu1 %v1370_v61  ;;  %1401 = vadd.xlane.f32.xlu0 %v1368_v13  ;;  %v1318_v40 = vadd.f32 %v2795_v1, %v1282_v62  ;;  %v1378_v37 = vmul.f32 %v2877_v32, %v2877_v32  ;;  %v2892_v49 = vmax.f32 %v1315_v42, 0.0  ;;  %v1317_v9 = vadd.f32 %v2795_v1, %v1281_v55 }
 0x1a0   :  { %v1377_v11 = vmul.f32 %v2879_v53, %v2879_v53  ;;  %v1284_v21 = vmul.f32 %v2791_v12, %v2697_v59  ;;  %v1283_v0 = vmul.f32 %v2791_v12, %v2688_v51  ;;  %v1380_v52 = vmul.f32 %v2885_v38, %v2885_v38 }
 0x1a1   :  { %v2901_v27 = vmax.f32 %v1318_v40, 0.0  ;;  %v1379_v4 = vmul.f32 %v2892_v49, %v2892_v49  ;;  %v2905_v22 = vmax.f32 %v1317_v9, 0.0  ;;  %v1286_v59 = vmul.f32 %v2791_v12, %v2714_v3 }
 0x1a2   :  { %v1320_v61 = vadd.f32 %v2795_v1, %v1284_v21  ;;  %v1319_v13 = vadd.f32 %v2795_v1, %v1283_v0  ;;  %v1285_v51 = vmul.f32 %v2791_v12, %v2706_v15  ;;  %v1288_v3 = vmul.f32 %v2791_v12, %v2725_v7 }
 0x1a3   :  { %1409 = vadd.xlane.f32.xlu1 %v1372_v8  ;;  %1407 = vadd.xlane.f32.xlu0 %v1371_v10  ;;  %v1382_v34 = vmul.f32 %v2901_v27, %v2901_v27  ;;  %v1322_v47 = vadd.f32 %v2795_v1, %v1286_v59  ;;  %v1381_v8 = vmul.f32 %v2905_v22, %v2905_v22 }
 0x1a4   :  { %v2918_v10 = vmax.f32 %v1320_v61, 0.0  ;;  %v2920_v57 = vmax.f32 %v1319_v13, 0.0  ;;  %v1321_v14 = vadd.f32 %v2795_v1, %v1285_v51  ;;  %v1287_v15 = vmul.f32 %v2791_v12, %v2720_v16 }
 0x1a5   :  { %v1324_v30 = vadd.f32 %v2795_v1, %v1288_v3  ;;  %v2933_v39 = vmax.f32 %v1322_v47, 0.0  ;;  %v1290_v7 = vmul.f32 %v2791_v12, %v2735_v50  ;;  %v1289_v16 = vmul.f32 %v2791_v12, %v2730_v63 }
 0x1a6   :  { %v1323_v54 = vadd.f32 %v2795_v1, %v1287_v15  ;;  %v2935_v5 = vmax.f32 %v1321_v14, 0.0  ;;  %v1292_v50 = vmul.f32 %v2791_v12, %v2746_v19  ;;  %v1291_v63 = vmul.f32 %v2791_v12, %v2740_v46 }
 0x1a7   :  { %1413 = vadd.xlane.f32.xlu1 %v1374_v24  ;;  %1411 = vadd.xlane.f32.xlu0 %v1373_v60  ;;  %v1384_v24 = vmul.f32 %v2918_v10, %v2918_v10  ;;  %v1383_v60 = vmul.f32 %v2920_v57, %v2920_v57  ;;  %v2941_v2 = vmax.f32 %v1324_v30, 0.0  ;;  %v1326_v33 = vadd.f32 %v2795_v1, %v1290_v7 }
 0x1a8   :  { %v1386_v41 = vmul.f32 %v2933_v39, %v2933_v39  ;;  %v1385_v42 = vmul.f32 %v2935_v5, %v2935_v5  ;;  %v1327_v9 = vadd.f32 %v2795_v1, %v1291_v63  ;;  %v1294_v19 = vmul.f32 %v2791_v12, %v2756_v25 }
 0x1a9   :  { %v1388_v62 = vmul.f32 %v2941_v2, %v2941_v2  ;;  %v2957_v55 = vmax.f32 %v1326_v33, 0.0  ;;  %v1293_v46 = vmul.f32 %v2791_v12, %v2751_v20  ;;  %v1296_v25 = vmul.f32 %v2791_v12, %v2766_v18 }
 0x1aa   :  { %v1330_v0 = vadd.f32 %v2795_v1, %v1294_v19  ;;  %v2976_v61 = vmax.f32 %v1327_v9, 0.0  ;;  %v1295_v20 = vmul.f32 %v2791_v12, %v2761_v29  ;;  %v1298_v29 = vmul.f32 %v2791_v12, %v2780_v36 }
 0x1ab   :  { %1417 = vadd.xlane.f32.xlu1 %v1376_v26  ;;  %1415 = vadd.xlane.f32.xlu0 %v1375_v28  ;;  %v2948_v26 = vmax.f32 %v1323_v54, 0.0  ;;  %v1325_v28 = vadd.f32 %v2795_v1, %v1289_v16  ;;  %v1390_v21 = vmul.f32 %v2957_v55, %v2957_v55  ;;  %v1329_v13 = vadd.f32 %v2795_v1, %v1293_v46 }
 0x1ac   :  { %v1332_v59 = vadd.f32 %v2795_v1, %v1296_v25  ;;  %v1331_v51 = vadd.f32 %v2795_v1, %v1295_v20  ;;  %v1391_v47 = vmul.f32 %v2976_v61, %v2976_v61  ;;  %v1297_v18 = vmul.f32 %v2791_v12, %v2774_v6 }
 0x1ad   :  { %v1387_v40 = vmul.f32 %v2948_v26, %v2948_v26  ;;  %v2991_v14 = vmax.f32 %v1329_v13, 0.0 }
 0x1ae   :  { %v2997_v3 = vmax.f32 %v1332_v59, 0.0  ;;  %v2999_v15 = vmax.f32 %v1331_v51, 0.0 }
 0x1af   :  { %1421 = vadd.xlane.f32.xlu1 %v1378_v37  ;;  %1419 = vadd.xlane.f32.xlu0 %v1377_v11  ;;  %v2961_v37 = vmax.f32 %v1325_v28, 0.0  ;;  %v1328_v11 = vadd.f32 %v2795_v1, %v1292_v50  ;;  %v1393_v54 = vmul.f32 %v2991_v14, %v2991_v14 }
 0x1b0   :  { %v1396_v36 = vmul.f32 %v2997_v3, %v2997_v3  ;;  %v1395_v6 = vmul.f32 %v2999_v15, %v2999_v15 }
 0x1b3   :  { %1425 = vadd.xlane.f32.xlu1 %v1380_v52  ;;  %1423 = vadd.xlane.f32.xlu0 %v1379_v4  ;;  %v1389_v52 = vmul.f32 %v2961_v37, %v2961_v37  ;;  %v2974_v4 = vmax.f32 %v1328_v11, 0.0 }
 0x1b7   :  { %1429 = vadd.xlane.f32.xlu1 %v1382_v34  ;;  %1427 = vadd.xlane.f32.xlu0 %v1381_v8  ;;  %v1392_v34 = vmul.f32 %v2974_v4, %v2974_v4  ;;  %v2989_v8 = vmax.f32 %v1330_v0, 0.0 }
 0x1b9   :  { %v1394_v30 = vmul.f32 %v2989_v8, %v2989_v8 }
 0x1bb   :  { %1433 = vadd.xlane.f32.xlu1 %v1384_v24  ;;  %1431 = vadd.xlane.f32.xlu0 %v1383_v60  ;;  %v1334_v24 = vadd.f32 %v2795_v1, %v1298_v29  ;;  %v1333_v60 = vadd.f32 %v2795_v1, %v1297_v18 }
 0x1bd   :  { %v3011_v12 = vmax.f32 %v1334_v24, 0.0  ;;  %v3013_v7 = vmax.f32 %v1333_v60, 0.0 }
 0x1bf   :  { %1437 = vadd.xlane.f32.xlu1 %v1386_v41  ;;  %1435 = vadd.xlane.f32.xlu0 %v1385_v42  ;;  %v1398_v16 = vmul.f32 %v3011_v12, %v3011_v12  ;;  %v1397_v1 = vmul.f32 %v3013_v7, %v3013_v7 }
 0x1c3   :  { %1441 = vadd.xlane.f32.xlu1 %v1388_v62  ;;  %1439 = vadd.xlane.f32.xlu0 %v1387_v40 }
 0x1c7   :  { %1445 = vadd.xlane.f32.xlu1 %v1390_v21  ;;  %1443 = vadd.xlane.f32.xlu0 %v1389_v52 }
 0x1cb   :  { %1449 = vadd.xlane.f32.xlu1 %v1392_v34  ;;  %1447 = vadd.xlane.f32.xlu0 %v1391_v47 }
 0x1cf   :  { %1453 = vadd.xlane.f32.xlu1 %v1394_v30  ;;  %1451 = vadd.xlane.f32.xlu0 %v1393_v54 }
 0x1d3   :  { %1457 = vadd.xlane.f32.xlu1 %v1396_v36  ;;  %1455 = vadd.xlane.f32.xlu0 %v1395_v6 }
 0x1d7   :  { %1461 = vadd.xlane.f32.xlu1 %v1398_v16  ;;  %1459 = vadd.xlane.f32.xlu0 %v1397_v1 }
 0x224   :  { %v1404_v33 = vpop.xlane.xlu1 %1403  ;;  %v1400_v41 = vpop.xlane.xlu0 %1399 }
 0x225   :  { %v1465_v42 = vmax.f32 %v1404_v33, 1e-24  ;;  %v1463_v28 = vmax.f32 %v1400_v41, 1e-24 }
 0x227   :  { %2060 = vrsqrt.f32 %v1465_v42 }
 0x228   :  { %2062 = vrsqrt.f32 %v1463_v28  ;;  %v1406_v50 = vpop.xlane.xlu1 %1405  ;;  %v1402_v63 = vpop.xlane.xlu0 %1401 }
 0x229   :  { %v1466_v62 = vmax.f32 %v1406_v50, 1e-24  ;;  %v1464_v40 = vmax.f32 %v1402_v63, 1e-24 }
 0x22b   :  { %2064 = vrsqrt.f32 %v1466_v62 }
 0x22c   :  { %2066 = vrsqrt.f32 %v1464_v40  ;;  %v1410_v11 = vpop.xlane.xlu1 %1409  ;;  %v1408_v9 = vpop.xlane.xlu0 %1407 }
 0x22d   :  { %v1468_v19 = vmax.f32 %v1410_v11, 1e-24  ;;  %v1467_v46 = vmax.f32 %v1408_v9, 1e-24 }
 0x22f   :  { %2068 = vrsqrt.f32 %v1468_v19 }
 0x230   :  { %2070 = vrsqrt.f32 %v1467_v46  ;;  %v1414_v21 = vpop.xlane.xlu1 %1413  ;;  %v1412_v0 = vpop.xlane.xlu0 %1411 }
 0x231   :  { %v1470_v52 = vmax.f32 %v1414_v21, 1e-24  ;;  %v1469_v13 = vmax.f32 %v1412_v0, 1e-24 }
 0x233   :  { %2072 = vrsqrt.f32 %v1470_v52 }
 0x234   :  { %v2061_v25 = vpop.eup %2060  ;;  %2074 = vrsqrt.f32 %v1469_v13  ;;  %v1418_v20 = vpop.xlane.xlu1 %1417 }
 0x235   :  { %v1416_v59 = vpop.xlane.xlu0 %1415  ;;  %v2063_v51 = vpop.eup %2062  ;;  %v1529_v34 = vmul.f32 %v2061_v25, %v2811_v56  ;;  %v1472_v47 = vmax.f32 %v1418_v20, 1e-24 }
 0x236   :  { %v1471_v29 = vmax.f32 %v1416_v59, 1e-24  ;;  %v1527_v18 = vmul.f32 %v2063_v51, %v2813_v45 }
 0x237   :  { %1561 = vst [vmem:[#allocation3 + $0x10] sm:$0xff] %v1529_v34  ;;  %2076 = vrsqrt.f32 %v1472_v47 }
 0x238   :  { %v2065_v30 = vpop.eup %2064  ;;  %1559 = vst [vmem:[#allocation3] sm:$0xff] %v1527_v18  ;;  %2078 = vrsqrt.f32 %v1471_v29  ;;  %v1422_v54 = vpop.xlane.xlu1 %1421 }
 0x239   :  { %v1420_v24 = vpop.xlane.xlu0 %1419  ;;  %v2067_v60 = vpop.eup %2066  ;;  %v1530_v36 = vmul.f32 %v2065_v30, %v2821_v35  ;;  %v1474_v6 = vmax.f32 %v1422_v54, 1e-24 }
 0x23a   :  { %v1473_v16 = vmax.f32 %v1420_v24, 1e-24  ;;  %v1528_v1 = vmul.f32 %v2067_v60, %v2823_v58 }
 0x23b   :  { %1562 = vst [vmem:[#allocation3 + $0x18] sm:$0xff] %v1530_v36  ;;  %2080 = vrsqrt.f32 %v1474_v6 }
 0x23c   :  { %v2069_v56 = vpop.eup %2068  ;;  %1560 = vst [vmem:[#allocation3 + $0x8] sm:$0xff] %v1528_v1  ;;  %2082 = vrsqrt.f32 %v1473_v16  ;;  %v1426_v45 = vpop.xlane.xlu1 %1425 }
 0x23d   :  { %v1424_v33 = vpop.xlane.xlu0 %1423  ;;  %v2071_v41 = vpop.eup %2070  ;;  %v1532_v42 = vmul.f32 %v2069_v56, %v2835_v17  ;;  %v1476_v28 = vmax.f32 %v1426_v45, 1e-24 }
 0x23e   :  { %v1475_v50 = vmax.f32 %v1424_v33, 1e-24  ;;  %v1531_v63 = vmul.f32 %v2071_v41, %v2837_v44 }
 0x23f   :  { %1564 = vst [vmem:[#allocation3 + $0x28] sm:$0xff] %v1532_v42  ;;  %2084 = vrsqrt.f32 %v1476_v28 }
 0x240   :  { %v2073_v35 = vpop.eup %2072  ;;  %1563 = vst [vmem:[#allocation3 + $0x20] sm:$0xff] %v1531_v63  ;;  %2086 = vrsqrt.f32 %v1475_v50  ;;  %v1430_v58 = vpop.xlane.xlu1 %1429 }
 0x241   :  { %v1428_v62 = vpop.xlane.xlu0 %1427  ;;  %v2075_v40 = vpop.eup %2074  ;;  %v1534_v11 = vmul.f32 %v2073_v35, %v2843_v48  ;;  %v1478_v9 = vmax.f32 %v1430_v58, 1e-24 }
 0x242   :  { %v1477_v19 = vmax.f32 %v1428_v62, 1e-24  ;;  %v1533_v46 = vmul.f32 %v2075_v40, %v2845_v43 }
 0x243   :  { %1566 = vst [vmem:[#allocation3 + $0x38] sm:$0xff] %v1534_v11  ;;  %2088 = vrsqrt.f32 %v1478_v9 }
 0x244   :  { %v2077_v17 = vpop.eup %2076  ;;  %1565 = vst [vmem:[#allocation3 + $0x30] sm:$0xff] %v1533_v46  ;;  %2090 = vrsqrt.f32 %v1477_v19  ;;  %v1434_v44 = vpop.xlane.xlu1 %1433 }
 0x245   :  { %v1432_v21 = vpop.xlane.xlu0 %1431  ;;  %v2079_v0 = vpop.eup %2078  ;;  %v1536_v52 = vmul.f32 %v2077_v17, %v2861_v23  ;;  %v1480_v13 = vmax.f32 %v1434_v44, 1e-24 }
 0x246   :  { %v1479_v25 = vmax.f32 %v1432_v21, 1e-24  ;;  %v1535_v20 = vmul.f32 %v2079_v0, %v2863_v31 }
 0x247   :  { %1568 = vst [vmem:[#allocation3 + $0x48] sm:$0xff] %v1536_v52  ;;  %2092 = vrsqrt.f32 %v1480_v13 }
 0x248   :  { %v2081_v48 = vpop.eup %2080  ;;  %1567 = vst [vmem:[#allocation3 + $0x40] sm:$0xff] %v1535_v20  ;;  %2094 = vrsqrt.f32 %v1479_v25  ;;  %v1438_v43 = vpop.xlane.xlu1 %1437 }
 0x249   :  { %v1436_v59 = vpop.xlane.xlu0 %1435  ;;  %v2083_v51 = vpop.eup %2082  ;;  %v1538_v34 = vmul.f32 %v2081_v48, %v2877_v32  ;;  %v1482_v47 = vmax.f32 %v1438_v43, 1e-24 }
 0x24a   :  { %v1481_v29 = vmax.f32 %v1436_v59, 1e-24  ;;  %v1537_v18 = vmul.f32 %v2083_v51, %v2879_v53 }
 0x24b   :  { %1570 = vst [vmem:[#allocation3 + $0x58] sm:$0xff] %v1538_v34  ;;  %2096 = vrsqrt.f32 %v1482_v47 }
 0x24c   :  { %v2085_v23 = vpop.eup %2084  ;;  %1569 = vst [vmem:[#allocation3 + $0x50] sm:$0xff] %v1537_v18  ;;  %2098 = vrsqrt.f32 %v1481_v29  ;;  %v1442_v31 = vpop.xlane.xlu1 %1441 }
 0x24d   :  { %v1440_v30 = vpop.xlane.xlu0 %1439  ;;  %v2087_v54 = vpop.eup %2086  ;;  %v1540_v24 = vmul.f32 %v2085_v23, %v2885_v38  ;;  %v1484_v60 = vmax.f32 %v1442_v31, 1e-24 }
 0x24e   :  { %v1483_v36 = vmax.f32 %v1440_v30, 1e-24  ;;  %v1539_v6 = vmul.f32 %v2087_v54, %v2892_v49 }
 0x24f   :  { %1572 = vst [vmem:[#allocation3 + $0x68] sm:$0xff] %v1540_v24  ;;  %2100 = vrsqrt.f32 %v1484_v60 }
 0x250   :  { %v2089_v32 = vpop.eup %2088  ;;  %1571 = vst [vmem:[#allocation3 + $0x60] sm:$0xff] %v1539_v6  ;;  %2102 = vrsqrt.f32 %v1483_v36  ;;  %v1446_v53 = vpop.xlane.xlu1 %1445 }
 0x251   :  { %v1444_v16 = vpop.xlane.xlu0 %1443  ;;  %v2091_v1 = vpop.eup %2090  ;;  %v1542_v56 = vmul.f32 %v2089_v32, %v2901_v27  ;;  %v1486_v45 = vmax.f32 %v1446_v53, 1e-24 }
 0x252   :  { %v1485_v33 = vmax.f32 %v1444_v16, 1e-24  ;;  %v1541_v41 = vmul.f32 %v2091_v1, %v2905_v22 }
 0x253   :  { %1574 = vst [vmem:[#allocation3 + $0x78] sm:$0xff] %v1542_v56  ;;  %2104 = vrsqrt.f32 %v1486_v45 }
 0x254   :  { %v2093_v38 = vpop.eup %2092  ;;  %1573 = vst [vmem:[#allocation3 + $0x70] sm:$0xff] %v1541_v41  ;;  %2106 = vrsqrt.f32 %v1485_v33  ;;  %v1450_v49 = vpop.xlane.xlu1 %1449 }
 0x255   :  { %v1448_v42 = vpop.xlane.xlu0 %1447  ;;  %v2095_v28 = vpop.eup %2094  ;;  %v1544_v50 = vmul.f32 %v2093_v38, %v2918_v10  ;;  %v1488_v63 = vmax.f32 %v1450_v49, 1e-24 }
 0x256   :  { %v1487_v35 = vmax.f32 %v1448_v42, 1e-24  ;;  %v1543_v58 = vmul.f32 %v2095_v28, %v2920_v57 }
 0x257   :  { %1576 = vst [vmem:[#allocation3 + $0x88] sm:$0xff] %v1544_v50  ;;  %2108 = vrsqrt.f32 %v1488_v63 }
 0x258   :  { %v2097_v27 = vpop.eup %2096  ;;  %1575 = vst [vmem:[#allocation3 + $0x80] sm:$0xff] %v1543_v58  ;;  %2110 = vrsqrt.f32 %v1487_v35  ;;  %v1454_v22 = vpop.xlane.xlu1 %1453 }
 0x259   :  { %v1452_v62 = vpop.xlane.xlu0 %1451  ;;  %v2099_v40 = vpop.eup %2098  ;;  %v1546_v11 = vmul.f32 %v2097_v27, %v2933_v39  ;;  %v1490_v9 = vmax.f32 %v1454_v22, 1e-24 }
 0x25a   :  { %v1489_v19 = vmax.f32 %v1452_v62, 1e-24  ;;  %v1545_v46 = vmul.f32 %v2099_v40, %v2935_v5 }
 0x25b   :  { %1578 = vst [vmem:[#allocation3 + $0x98] sm:$0xff] %v1546_v11  ;;  %2112 = vrsqrt.f32 %v1490_v9 }
 0x25c   :  { %v2101_v10 = vpop.eup %2100  ;;  %1577 = vst [vmem:[#allocation3 + $0x90] sm:$0xff] %v1545_v46  ;;  %2114 = vrsqrt.f32 %v1489_v19  ;;  %v1458_v57 = vpop.xlane.xlu1 %1457 }
 0x25d   :  { %v1456_v17 = vpop.xlane.xlu0 %1455  ;;  %v2103_v44 = vpop.eup %2102  ;;  %v1548_v21 = vmul.f32 %v2101_v10, %v2941_v2  ;;  %v1492_v0 = vmax.f32 %v1458_v57, 1e-24 }
 0x25e   :  { %v1491_v52 = vmax.f32 %v1456_v17, 1e-24  ;;  %v1547_v13 = vmul.f32 %v2103_v44, %v2948_v26 }
 0x25f   :  { %1580 = vst [vmem:[#allocation3 + $0xa8] sm:$0xff] %v1548_v21  ;;  %2116 = vrsqrt.f32 %v1492_v0 }
 0x260   :  { %v2105_v39 = vpop.eup %2104  ;;  %1579 = vst [vmem:[#allocation3 + $0xa0] sm:$0xff] %v1547_v13  ;;  %2118 = vrsqrt.f32 %v1491_v52  ;;  %v1462_v5 = vpop.xlane.xlu1 %1461 }
 0x261   :  { %v1460_v25 = vpop.xlane.xlu0 %1459  ;;  %v2107_v20 = vpop.eup %2106  ;;  %v1550_v48 = vmul.f32 %v2105_v39, %v2957_v55  ;;  %v1494_v43 = vmax.f32 %v1462_v5, 1e-24 }
 0x262   :  { %v1493_v59 = vmax.f32 %v1460_v25, 1e-24  ;;  %v1549_v51 = vmul.f32 %v2107_v20, %v2961_v37 }
 0x263   :  { %1582 = vst [vmem:[#allocation3 + $0xb8] sm:$0xff] %v1550_v48  ;;  %2120 = vrsqrt.f32 %v1494_v43 }
 0x264   :  { %v2109_v2 = vpop.eup %2108  ;;  %1581 = vst [vmem:[#allocation3 + $0xb0] sm:$0xff] %v1549_v51  ;;  %2122 = vrsqrt.f32 %v1493_v59 }
 0x265   :  { %v2111_v26 = vpop.eup %2110  ;;  %v1552_v34 = vmul.f32 %v2109_v2, %v2974_v4 }
 0x266   :  { %v1551_v47 = vmul.f32 %v2111_v26, %v2976_v61 }
 0x267   :  { %1584 = vst [vmem:[#allocation3 + $0xc8] sm:$0xff] %v1552_v34 }
 0x268   :  { %v2113_v29 = vpop.eup %2112  ;;  %1583 = vst [vmem:[#allocation3 + $0xc0] sm:$0xff] %v1551_v47 }
 0x269   :  { %v2115_v18 = vpop.eup %2114  ;;  %v1554_v55 = vmul.f32 %v2113_v29, %v2989_v8 }
 0x26a   :  { %v1553_v23 = vmul.f32 %v2115_v18, %v2991_v14 }
 0x26b   :  { %1586 = vst [vmem:[#allocation3 + $0xd8] sm:$0xff] %v1554_v55 }
 0x26c   :  { %v2117_v37 = vpop.eup %2116  ;;  %1585 = vst [vmem:[#allocation3 + $0xd0] sm:$0xff] %v1553_v23 }
 0x26d   :  { %v2119_v31 = vpop.eup %2118  ;;  %v1556_v30 = vmul.f32 %v2117_v37, %v2997_v3 }
 0x26e   :  { %v1555_v54 = vmul.f32 %v2119_v31, %v2999_v15 }
 0x26f   :  { %1588 = vst [vmem:[#allocation3 + $0xe8] sm:$0xff] %v1556_v30 }
 0x270   :  { %v2121_v4 = vpop.eup %2120  ;;  %1587 = vst [vmem:[#allocation3 + $0xe0] sm:$0xff] %v1555_v54 }
 0x271   :  { %v2123_v61 = vpop.eup %2122  ;;  %v1558_v24 = vmul.f32 %v2121_v4, %v3011_v12 }
 0x272   :  { %v1557_v8 = vmul.f32 %v2123_v61, %v3013_v7 }
 0x273   :  { %1590 = vst [vmem:[#allocation3 + $0xf8] sm:$0xff] %v1558_v24 }
 0x274   :  { %1589 = vst [vmem:[#allocation3 + $0xf0] sm:$0xff] %v1557_v8 }
 0x275   :  { %2135 = shalt.err (!%p2132_p4)
}
 0x276   :  { %s2147_s15 = smov 128   ;;  %s2148_s16 = smov 8  }
 0x277   :  { %1602 = dma.vmem_to_hbm [thread:$0]  %s1597_s13, 4096, %s3057_s3, [#allocation4], %s2147_s15, %s2147_s15, %s2148_s16  }
 0x278   :  { %2144 = dma.done.wait [#allocation4], 4096  }
 0x279   :  { %2145 = vsyncadd [#allocation4], 4294963200 }
 0x27a   :  { %1606 = vsyncpa [#allocation4], 1 }

</bundles_post_ra>
